<compile_context>
chip_gen: v6e
topology: v6e:2x2x1
jax: 0.10.0
libtpu: 0.0.40
codegen_flags: <defaults>
</compile_context>

<pallas_src>
import functools

import jax
import jax.numpy as jnp
from jax.experimental import pallas as pl
from jax.experimental.pallas import tpu as pltpu


# Row indices inside the packed (8, D) bias/affine tensor.
_B_COMB, _GAMMA1, _BETA1, _BW2, _GAMMA2, _BETA2 = 0, 1, 2, 3, 4, 5


def _encoder_layer_kernel(
    x_ref,          # (Bt, S, D) f32   Bt problem instances
    wqkv_ref,       # (D, 3*Hd)  mm    fused [Wq | Wk | Wv]
    wcomb_ref,      # (Hd, D)    mm    multi_head_combine weight
    w1_ref,         # (D, F)     mm
    w2_ref,         # (F, D)     mm
    bw1_ref,        # (1, F)     f32
    pvec_ref,       # (8, D)     f32   packed: bcomb,g1,b1,bw2,g2,b2,0,0
    o_ref,          # (Bt, S, D)
    *, head_num, qkv_dim, eps, mm_dtype, approx_recip,
):
    Bt, S, D = x_ref.shape
    Hd = head_num * qkv_dim
    M = Bt * S
    scale = 1.0 / (qkv_dim ** 0.5)

    x3 = x_ref[...].astype(jnp.float32)          # (Bt, S, D)
    xf = x3.reshape(M, D)                        # flattened token slab

    # ---- fused QKV projection: one lane-dense (M,128)@(128,384) matmul ----
    qkv = jnp.dot(xf.astype(mm_dtype), wqkv_ref[...],
                  preferred_element_type=jnp.float32)          # (M, 3*Hd) f32
    q3 = qkv[:, 0 * Hd:1 * Hd].reshape(Bt, S, Hd)
    k3 = qkv[:, 1 * Hd:2 * Hd].reshape(Bt, S, Hd)
    v3 = qkv[:, 2 * Hd:3 * Hd].reshape(Bt, S, Hd)

    # ---- attention core: per head, batched over the Bt instances ----
    head_outs = []
    for h in range(head_num):
        sl = slice(h * qkv_dim, (h + 1) * qkv_dim)
        qh = q3[:, :, sl].astype(mm_dtype)                     # (Bt, S, dk)
        kh = k3[:, :, sl].astype(mm_dtype)
        vh = v3[:, :, sl].astype(mm_dtype)
        s = jnp.einsum("bqd,bkd->bqk", qh, kh,
                       preferred_element_type=jnp.float32) * scale   # (Bt,S,S)
        s = s - jnp.max(s, axis=-1, keepdims=True)
        p = jnp.exp(s)
        denom = jnp.sum(p, axis=-1, keepdims=True)             # (Bt,S,1)
        oh = jnp.einsum("bqk,bkd->bqd", p.astype(mm_dtype), vh,
                        preferred_element_type=jnp.float32)    # (Bt,S,dk)
        # Deferred softmax normalization: scale the small head output (EUP
        # reciprocal in a free slot) instead of dividing the (S,S) matrix.
        head_outs.append(oh * pl.reciprocal(denom, approx=approx_recip))

    oc = jnp.concatenate(head_outs, axis=-1).reshape(M, Hd)    # (M, Hd) f32

    # ---- multi_head_combine: one (M,128)@(128,128) matmul ----
    mho = (jnp.dot(oc.astype(mm_dtype), wcomb_ref[...],
                   preferred_element_type=jnp.float32)
           + pvec_ref[_B_COMB:_B_COMB + 1, :])                 # (M, D)

    # ---- Add & InstanceNorm 1 (stats over seq, per instance & channel) ----
    y = x3 + mho.reshape(Bt, S, D)
    mu = jnp.mean(y, axis=1, keepdims=True)
    var = jnp.mean((y - mu) * (y - mu), axis=1, keepdims=True)
    out1 = ((y - mu) * jax.lax.rsqrt(var + eps)
            * pvec_ref[_GAMMA1:_GAMMA1 + 1, :]
            + pvec_ref[_BETA1:_BETA1 + 1, :])                  # (Bt, S, D)

    # ---- FeedForward: W2(relu(W1(out1))) ----
    # TODO(synk): if Bt*S grows past ~512 rows, tile this over row chunks
    # (lax.fori_loop) to bound the (M, F) f32 intermediate; Bt is sized so
    # Bt*S <= 256 here.
    o1f = out1.reshape(M, D)
    h1 = jnp.maximum(
        jnp.dot(o1f.astype(mm_dtype), w1_ref[...],
                preferred_element_type=jnp.float32) + bw1_ref[...], 0.0)
    ff = (jnp.dot(h1.astype(mm_dtype), w2_ref[...],
                  preferred_element_type=jnp.float32)
          + pvec_ref[_BW2:_BW2 + 1, :])                        # (M, D)

    # ---- Add & InstanceNorm 2 ----
    y2 = out1 + ff.reshape(Bt, S, D)
    mu2 = jnp.mean(y2, axis=1, keepdims=True)
    var2 = jnp.mean((y2 - mu2) * (y2 - mu2), axis=1, keepdims=True)
    out3 = ((y2 - mu2) * jax.lax.rsqrt(var2 + eps)
            * pvec_ref[_GAMMA2:_GAMMA2 + 1, :]
            + pvec_ref[_BETA2:_BETA2 + 1, :])

    o_ref[...] = out3.astype(o_ref.dtype)


def _pick_block_batch(B, S, target_rows=256):
    """Largest divisor Bt of B with Bt*S ~<= target_rows and >=2 grid steps."""
    want = max(1, target_rows // max(S, 1))
    if B >= 2:
        want = min(want, B // 2)      # keep >=2 grid steps (v7x has 2 TCs)
    want = min(want, B)
    bt = 1
    for d in range(1, want + 1):
        if B % d == 0:
            bt = d
    return bt


def encoder_layer_forward(x, params, *, head_num, qkv_dim, eps=1e-5,
                          use_bf16=True, target_rows=256):
    """x: (B, S, D) f32; params hold nn.Linear-style (out_features, in_features) weights."""
    B, S, D = x.shape
    Hd = head_num * qkv_dim
    F = params["w1"].shape[0]
    mm_dtype = jnp.bfloat16 if use_bf16 else jnp.float32

    # ---- glue: fuse / pre-transpose weights so the kernel is pure matmuls ----
    wqkv = jnp.concatenate(
        [params["wq"].T, params["wk"].T, params["wv"].T], axis=1).astype(mm_dtype)  # (D, 3*Hd)
    wcomb = params["wcomb"].T.astype(mm_dtype)                                      # (Hd, D)
    w1_t = params["w1"].T.astype(mm_dtype)                                          # (D, F)
    w2_t = params["w2"].T.astype(mm_dtype)                                          # (F, D)
    bw1 = params["bw1"].reshape(1, F).astype(jnp.float32)
    pvec = jnp.zeros((8, D), jnp.float32)
    pvec = pvec.at[_B_COMB].set(params["bcomb"])
    pvec = pvec.at[_GAMMA1].set(params["gamma1"])
    pvec = pvec.at[_BETA1].set(params["beta1"])
    pvec = pvec.at[_BW2].set(params["bw2"])
    pvec = pvec.at[_GAMMA2].set(params["gamma2"])
    pvec = pvec.at[_BETA2].set(params["beta2"])

    Bt = _pick_block_batch(B, S, target_rows)
    grid = (B // Bt,)

    def const_spec(shape):
        n = len(shape)
        return pl.BlockSpec(shape, lambda i, _n=n: (0,) * _n)

    M = B * S
    flops = (2 * M * D * 3 * Hd                        # fused QKV projection
             + 2 * 2 * head_num * B * S * S * qkv_dim  # scores + attn@v
             + 2 * M * Hd * D                          # combine
             + 2 * M * D * F + 2 * M * F * D)          # feed-forward
    mm_bytes = 2 if use_bf16 else 4
    weight_bytes = (wqkv.size + wcomb.size + w1_t.size + w2_t.size) * mm_bytes \
        + (bw1.size + pvec.size) * 4
    cost = pl.CostEstimate(
        flops=int(flops),
        transcendentals=int(B * head_num * S * S + 2 * B * D),
        bytes_accessed=int(2 * B * S * D * 4 + weight_bytes))

    kernel = functools.partial(
        _encoder_layer_kernel, head_num=head_num, qkv_dim=qkv_dim,
        eps=float(eps), mm_dtype=mm_dtype, approx_recip=bool(use_bf16))

    return pl.pallas_call(
        kernel,
        out_shape=jax.ShapeDtypeStruct((B, S, D), x.dtype),
        grid_spec=pltpu.PrefetchScalarGridSpec(
            num_scalar_prefetch=0,
            grid=grid,                                         # Bt instances / step
            in_specs=[
                pl.BlockSpec((Bt, S, D), lambda i: (i, 0, 0)),  # x tile (pipelined)
                const_spec((D, 3 * Hd)),                        # fused Wqkv (VMEM-resident)
                const_spec((Hd, D)),                            # W_combine
                const_spec((D, F)),                             # W1
                const_spec((F, D)),                             # W2
                const_spec((1, F)),                             # b1
                const_spec((8, D)),                             # packed biases / affine
            ],
            out_specs=pl.BlockSpec((Bt, S, D), lambda i: (i, 0, 0)),
        ),
        compiler_params=pltpu.CompilerParams(
            dimension_semantics=("parallel",),    # independent instances -> megacore
            vmem_limit_bytes=32 * 1024 * 1024,    # plenty for Bt*S<=256 tiles; v7x-safe
        ),
        cost_estimate=cost,
    )(x, wqkv, wcomb, w1_t, w2_t, bw1, pvec)


def encoder_layer_ref(x, p, *, head_num, qkv_dim, eps=1e-5):
    """Pure-JAX reference matching the PyTorch norm_last / instance-norm path."""
    B, S, D = x.shape

    def lin(v, w, b=None):
        y = jnp.einsum("bsd,od->bso", v, w)
        return y + b if b is not None else y

    def by_heads(t):
        return t.reshape(B, S, head_num, qkv_dim).transpose(0, 2, 1, 3)

    q = by_heads(lin(x, p["wq"]))
    k = by_heads(lin(x, p["wk"]))
    v = by_heads(lin(x, p["wv"]))
    score = jnp.einsum("bhqd,bhkd->bhqk", q, k) / jnp.sqrt(jnp.float32(qkv_dim))
    w = jax.nn.softmax(score, axis=-1)
    out = jnp.einsum("bhqk,bhkd->bhqd", w, v)
    out_concat = out.transpose(0, 2, 1, 3).reshape(B, S, head_num * qkv_dim)
    mho = lin(out_concat, p["wcomb"], p["bcomb"])

    def inorm(y, g, b):
        mu = y.mean(axis=1, keepdims=True)
        var = ((y - mu) ** 2).mean(axis=1, keepdims=True)
        return (y - mu) * jax.lax.rsqrt(var + eps) * g + b

    out1 = inorm(x + mho, p["gamma1"], p["beta1"])
    ff = lin(jnp.maximum(lin(out1, p["w1"], p["bw1"]), 0.0), p["w2"], p["bw2"])
    return inorm(out1 + ff, p["gamma2"], p["beta2"])


if __name__ == "__main__":
    embedding_dim = 128   # = head_num * qkv_dim (POMO default), lane-dense
    head_num = 8
    qkv_dim = 16
    ff_hidden_dim = 512
    batch, seq = 2, 8

    key = jax.random.PRNGKey(0)
    keys = jax.random.split(key, 12)

    def uinit(k, shape, fan_in):
        bound = 1.0 / (fan_in ** 0.5)
        return jax.random.uniform(k, shape, minval=-bound, maxval=bound,
                                  dtype=jnp.float32)

    Hd = head_num * qkv_dim
    params = dict(
        wq=uinit(keys[0], (Hd, embedding_dim), embedding_dim),
        wk=uinit(keys[1], (Hd, embedding_dim), embedding_dim),
        wv=uinit(keys[2], (Hd, embedding_dim), embedding_dim),
        wcomb=uinit(keys[3], (embedding_dim, Hd), Hd),
        bcomb=uinit(keys[4], (embedding_dim,), Hd),
        gamma1=1.0 + 0.1 * uinit(keys[5], (embedding_dim,), 1),
        beta1=0.1 * uinit(keys[6], (embedding_dim,), 1),
        w1=uinit(keys[7], (ff_hidden_dim, embedding_dim), embedding_dim),
        bw1=uinit(keys[8], (ff_hidden_dim,), embedding_dim),
        w2=uinit(keys[9], (embedding_dim, ff_hidden_dim), ff_hidden_dim),
        bw2=uinit(keys[10], (embedding_dim,), ff_hidden_dim),
        gamma2=1.0 + 0.1 * uinit(keys[5], (embedding_dim,), 1),
        beta2=0.1 * uinit(keys[6], (embedding_dim,), 1),
    )
    x = jax.random.normal(keys[11], (batch, seq, embedding_dim), dtype=jnp.float32)

    y_ref = encoder_layer_ref(x, params, head_num=head_num, qkv_dim=qkv_dim)

    # Strict semantics check: f32 MXU operands.
    fwd_f32 = jax.jit(functools.partial(encoder_layer_forward, head_num=head_num,
                                        qkv_dim=qkv_dim, use_bf16=False))
    y32 = jax.block_until_ready(fwd_f32(x, params))
    assert y32.shape == (batch, seq, embedding_dim)
    err32 = float(jnp.max(jnp.abs(y32 - y_ref)))
    assert jnp.allclose(y32, y_ref, atol=1e-4, rtol=1e-4), err32

    # Performance config: bf16 MXU operands with f32 accumulation / norms
    # (looser tolerance: bf16 operand rounding dominates).
    fwd_bf16 = jax.jit(functools.partial(encoder_layer_forward, head_num=head_num,
                                         qkv_dim=qkv_dim, use_bf16=True))
    ybf = jax.block_until_ready(fwd_bf16(x, params))
    errbf = float(jnp.max(jnp.abs(ybf - y_ref)))
    assert jnp.allclose(ybf, y_ref, atol=2e-1, rtol=2e-1), errbf

    print("KERNEL_OK")
</pallas_src>

<mosaic_0001>
module attributes {stable_mosaic.version = 11 : i64} {
  func.func @_encoder_layer_kernel(%arg0: i32, %arg1: memref<1x8x128xf32, #tpu.memory_space<vmem>>, %arg2: memref<128x384xf32, #tpu.memory_space<vmem>>, %arg3: memref<128x128xf32, #tpu.memory_space<vmem>>, %arg4: memref<128x512xf32, #tpu.memory_space<vmem>>, %arg5: memref<512x128xf32, #tpu.memory_space<vmem>>, %arg6: memref<1x512xf32, #tpu.memory_space<vmem>>, %arg7: memref<8x128xf32, #tpu.memory_space<vmem>>, %arg8: memref<1x8x128xf32, #tpu.memory_space<vmem>>) attributes {dimension_semantics = [#tpu.dimension_semantics<parallel>], iteration_bounds = array<i64: 2>, scalar_prefetch = 0 : i64, scratch_operands = 0 : i64, tpu.core_type = #tpu.core_type<tc>, window_params = [{transform_indices = @transform_0, window_bounds = array<i64: 1, 8, 128>}, {pipeline_mode = #tpu.pipeline_mode<synchronous>, transform_indices = @transform_1, window_bounds = array<i64: 128, 384>}, {pipeline_mode = #tpu.pipeline_mode<synchronous>, transform_indices = @transform_2, window_bounds = array<i64: 128, 128>}, {pipeline_mode = #tpu.pipeline_mode<synchronous>, transform_indices = @transform_3, window_bounds = array<i64: 128, 512>}, {pipeline_mode = #tpu.pipeline_mode<synchronous>, transform_indices = @transform_4, window_bounds = array<i64: 512, 128>}, {pipeline_mode = #tpu.pipeline_mode<synchronous>, transform_indices = @transform_5, window_bounds = array<i64: 1, 512>}, {pipeline_mode = #tpu.pipeline_mode<synchronous>, transform_indices = @transform_6, window_bounds = array<i64: 8, 128>}, {transform_indices = @transform_7, window_bounds = array<i64: 1, 8, 128>}]} {
    %c0 = arith.constant 0 : index
    %c0_0 = arith.constant 0 : index
    %c0_1 = arith.constant 0 : index
    %0 = vector.load %arg1[%c0, %c0_0, %c0_1] : memref<1x8x128xf32, #tpu.memory_space<vmem>>, vector<1x8x128xf32>
    %1 = vector.shape_cast %0 : vector<1x8x128xf32> to vector<8x128xf32>
    %c0_2 = arith.constant 0 : index
    %c0_3 = arith.constant 0 : index
    %2 = vector.load %arg2[%c0_2, %c0_3] : memref<128x384xf32, #tpu.memory_space<vmem>>, vector<128x384xf32>
    %cst = arith.constant dense<0.000000e+00> : vector<8x384xf32>
    %3 = tpu.matmul %1, %2, %cst {dimension_numbers = #tpu.dot_dimension_numbers<[1], [0], [0], [1], [0, 0, 1, 1], [], []>} : vector<8x128xf32>, vector<128x384xf32>, vector<8x384xf32> -> vector<8x384xf32>
    %4 = vector.extract_strided_slice %3 {offsets = [0, 0], sizes = [8, 128], strides = [1, 1]} : vector<8x384xf32> to vector<8x128xf32>
    %5 = vector.shape_cast %4 : vector<8x128xf32> to vector<1x8x128xf32>
    %6 = vector.extract_strided_slice %3 {offsets = [0, 128], sizes = [8, 128], strides = [1, 1]} : vector<8x384xf32> to vector<8x128xf32>
    %7 = vector.shape_cast %6 : vector<8x128xf32> to vector<1x8x128xf32>
    %8 = vector.extract_strided_slice %3 {offsets = [0, 256], sizes = [8, 128], strides = [1, 1]} : vector<8x384xf32> to vector<8x128xf32>
    %9 = vector.shape_cast %8 : vector<8x128xf32> to vector<1x8x128xf32>
    %10 = vector.extract_strided_slice %5 {offsets = [0, 0, 0], sizes = [1, 8, 16], strides = [1, 1, 1]} : vector<1x8x128xf32> to vector<1x8x16xf32>
    %11 = vector.extract_strided_slice %7 {offsets = [0, 0, 0], sizes = [1, 8, 16], strides = [1, 1, 1]} : vector<1x8x128xf32> to vector<1x8x16xf32>
    %12 = vector.extract_strided_slice %9 {offsets = [0, 0, 0], sizes = [1, 8, 16], strides = [1, 1, 1]} : vector<1x8x128xf32> to vector<1x8x16xf32>
    "tpu.trace_start"() <{level = 10 : i32, message = "bqd,bkd->bqk"}> : () -> ()
    %cst_4 = arith.constant dense<0.000000e+00> : vector<1x8x8xf32>
    %13 = tpu.matmul %10, %11, %cst_4 {dimension_numbers = #tpu.dot_dimension_numbers<[2], [2], [1], [1], [0, 0, 0, 1, 1, 1], [0], [0]>} : vector<1x8x16xf32>, vector<1x8x16xf32>, vector<1x8x8xf32> -> vector<1x8x8xf32>
    "tpu.trace_stop"() : () -> ()
    %cst_5 = arith.constant 2.500000e-01 : f32
    %14 = vector.broadcast %cst_5 : f32 to vector<1x8x8xf32>
    %15 = arith.mulf %13, %14 : vector<1x8x8xf32>
    %cst_6 = arith.constant dense<0xFF800000> : vector<1x8xf32>
    %16 = vector.multi_reduction <maximumf>, %15, %cst_6 [2] : vector<1x8x8xf32> to vector<1x8xf32>
    %17 = vector.shape_cast %16 : vector<1x8xf32> to vector<1x8x1xf32>
    %18 = vector.broadcast %17 : vector<1x8x1xf32> to vector<1x8x8xf32>
    %19 = arith.subf %15, %18 : vector<1x8x8xf32>
    %20 = math.exp %19 : vector<1x8x8xf32>
    %cst_7 = arith.constant dense<0.000000e+00> : vector<1x8xf32>
    %21 = vector.multi_reduction <add>, %20, %cst_7 [2] : vector<1x8x8xf32> to vector<1x8xf32>
    %22 = vector.shape_cast %21 : vector<1x8xf32> to vector<1x8x1xf32>
    "tpu.trace_start"() <{level = 10 : i32, message = "bqk,bkd->bqd"}> : () -> ()
    %cst_8 = arith.constant dense<0.000000e+00> : vector<1x8x16xf32>
    %23 = tpu.matmul %20, %12, %cst_8 {dimension_numbers = #tpu.dot_dimension_numbers<[2], [1], [1], [2], [0, 0, 0, 1, 1, 2], [0], [0]>} : vector<1x8x8xf32>, vector<1x8x16xf32>, vector<1x8x16xf32> -> vector<1x8x16xf32>
    "tpu.trace_stop"() : () -> ()
    %24 = tpu.reciprocal %22 : vector<1x8x1xf32> -> vector<1x8x1xf32>
    %25 = vector.broadcast %24 : vector<1x8x1xf32> to vector<1x8x16xf32>
    %26 = arith.mulf %23, %25 : vector<1x8x16xf32>
    %27 = vector.extract_strided_slice %5 {offsets = [0, 0, 16], sizes = [1, 8, 16], strides = [1, 1, 1]} : vector<1x8x128xf32> to vector<1x8x16xf32>
    %28 = vector.extract_strided_slice %7 {offsets = [0, 0, 16], sizes = [1, 8, 16], strides = [1, 1, 1]} : vector<1x8x128xf32> to vector<1x8x16xf32>
    %29 = vector.extract_strided_slice %9 {offsets = [0, 0, 16], sizes = [1, 8, 16], strides = [1, 1, 1]} : vector<1x8x128xf32> to vector<1x8x16xf32>
    "tpu.trace_start"() <{level = 10 : i32, message = "bqd,bkd->bqk"}> : () -> ()
    %cst_9 = arith.constant dense<0.000000e+00> : vector<1x8x8xf32>
    %30 = tpu.matmul %27, %28, %cst_9 {dimension_numbers = #tpu.dot_dimension_numbers<[2], [2], [1], [1], [0, 0, 0, 1, 1, 1], [0], [0]>} : vector<1x8x16xf32>, vector<1x8x16xf32>, vector<1x8x8xf32> -> vector<1x8x8xf32>
    "tpu.trace_stop"() : () -> ()
    %cst_10 = arith.constant 2.500000e-01 : f32
    %31 = vector.broadcast %cst_10 : f32 to vector<1x8x8xf32>
    %32 = arith.mulf %30, %31 : vector<1x8x8xf32>
    %cst_11 = arith.constant dense<0xFF800000> : vector<1x8xf32>
    %33 = vector.multi_reduction <maximumf>, %32, %cst_11 [2] : vector<1x8x8xf32> to vector<1x8xf32>
    %34 = vector.shape_cast %33 : vector<1x8xf32> to vector<1x8x1xf32>
    %35 = vector.broadcast %34 : vector<1x8x1xf32> to vector<1x8x8xf32>
    %36 = arith.subf %32, %35 : vector<1x8x8xf32>
    %37 = math.exp %36 : vector<1x8x8xf32>
    %cst_12 = arith.constant dense<0.000000e+00> : vector<1x8xf32>
    %38 = vector.multi_reduction <add>, %37, %cst_12 [2] : vector<1x8x8xf32> to vector<1x8xf32>
    %39 = vector.shape_cast %38 : vector<1x8xf32> to vector<1x8x1xf32>
    "tpu.trace_start"() <{level = 10 : i32, message = "bqk,bkd->bqd"}> : () -> ()
    %cst_13 = arith.constant dense<0.000000e+00> : vector<1x8x16xf32>
    %40 = tpu.matmul %37, %29, %cst_13 {dimension_numbers = #tpu.dot_dimension_numbers<[2], [1], [1], [2], [0, 0, 0, 1, 1, 2], [0], [0]>} : vector<1x8x8xf32>, vector<1x8x16xf32>, vector<1x8x16xf32> -> vector<1x8x16xf32>
    "tpu.trace_stop"() : () -> ()
    %41 = tpu.reciprocal %39 : vector<1x8x1xf32> -> vector<1x8x1xf32>
    %42 = vector.broadcast %41 : vector<1x8x1xf32> to vector<1x8x16xf32>
    %43 = arith.mulf %40, %42 : vector<1x8x16xf32>
    %44 = vector.extract_strided_slice %5 {offsets = [0, 0, 32], sizes = [1, 8, 16], strides = [1, 1, 1]} : vector<1x8x128xf32> to vector<1x8x16xf32>
    %45 = vector.extract_strided_slice %7 {offsets = [0, 0, 32], sizes = [1, 8, 16], strides = [1, 1, 1]} : vector<1x8x128xf32> to vector<1x8x16xf32>
    %46 = vector.extract_strided_slice %9 {offsets = [0, 0, 32], sizes = [1, 8, 16], strides = [1, 1, 1]} : vector<1x8x128xf32> to vector<1x8x16xf32>
    "tpu.trace_start"() <{level = 10 : i32, message = "bqd,bkd->bqk"}> : () -> ()
    %cst_14 = arith.constant dense<0.000000e+00> : vector<1x8x8xf32>
    %47 = tpu.matmul %44, %45, %cst_14 {dimension_numbers = #tpu.dot_dimension_numbers<[2], [2], [1], [1], [0, 0, 0, 1, 1, 1], [0], [0]>} : vector<1x8x16xf32>, vector<1x8x16xf32>, vector<1x8x8xf32> -> vector<1x8x8xf32>
    "tpu.trace_stop"() : () -> ()
    %cst_15 = arith.constant 2.500000e-01 : f32
    %48 = vector.broadcast %cst_15 : f32 to vector<1x8x8xf32>
    %49 = arith.mulf %47, %48 : vector<1x8x8xf32>
    %cst_16 = arith.constant dense<0xFF800000> : vector<1x8xf32>
    %50 = vector.multi_reduction <maximumf>, %49, %cst_16 [2] : vector<1x8x8xf32> to vector<1x8xf32>
    %51 = vector.shape_cast %50 : vector<1x8xf32> to vector<1x8x1xf32>
    %52 = vector.broadcast %51 : vector<1x8x1xf32> to vector<1x8x8xf32>
    %53 = arith.subf %49, %52 : vector<1x8x8xf32>
    %54 = math.exp %53 : vector<1x8x8xf32>
    %cst_17 = arith.constant dense<0.000000e+00> : vector<1x8xf32>
    %55 = vector.multi_reduction <add>, %54, %cst_17 [2] : vector<1x8x8xf32> to vector<1x8xf32>
    %56 = vector.shape_cast %55 : vector<1x8xf32> to vector<1x8x1xf32>
    "tpu.trace_start"() <{level = 10 : i32, message = "bqk,bkd->bqd"}> : () -> ()
    %cst_18 = arith.constant dense<0.000000e+00> : vector<1x8x16xf32>
    %57 = tpu.matmul %54, %46, %cst_18 {dimension_numbers = #tpu.dot_dimension_numbers<[2], [1], [1], [2], [0, 0, 0, 1, 1, 2], [0], [0]>} : vector<1x8x8xf32>, vector<1x8x16xf32>, vector<1x8x16xf32> -> vector<1x8x16xf32>
    "tpu.trace_stop"() : () -> ()
    %58 = tpu.reciprocal %56 : vector<1x8x1xf32> -> vector<1x8x1xf32>
    %59 = vector.broadcast %58 : vector<1x8x1xf32> to vector<1x8x16xf32>
    %60 = arith.mulf %57, %59 : vector<1x8x16xf32>
    %61 = vector.extract_strided_slice %5 {offsets = [0, 0, 48], sizes = [1, 8, 16], strides = [1, 1, 1]} : vector<1x8x128xf32> to vector<1x8x16xf32>
    %62 = vector.extract_strided_slice %7 {offsets = [0, 0, 48], sizes = [1, 8, 16], strides = [1, 1, 1]} : vector<1x8x128xf32> to vector<1x8x16xf32>
    %63 = vector.extract_strided_slice %9 {offsets = [0, 0, 48], sizes = [1, 8, 16], strides = [1, 1, 1]} : vector<1x8x128xf32> to vector<1x8x16xf32>
    "tpu.trace_start"() <{level = 10 : i32, message = "bqd,bkd->bqk"}> : () -> ()
    %cst_19 = arith.constant dense<0.000000e+00> : vector<1x8x8xf32>
    %64 = tpu.matmul %61, %62, %cst_19 {dimension_numbers = #tpu.dot_dimension_numbers<[2], [2], [1], [1], [0, 0, 0, 1, 1, 1], [0], [0]>} : vector<1x8x16xf32>, vector<1x8x16xf32>, vector<1x8x8xf32> -> vector<1x8x8xf32>
    "tpu.trace_stop"() : () -> ()
    %cst_20 = arith.constant 2.500000e-01 : f32
    %65 = vector.broadcast %cst_20 : f32 to vector<1x8x8xf32>
    %66 = arith.mulf %64, %65 : vector<1x8x8xf32>
    %cst_21 = arith.constant dense<0xFF800000> : vector<1x8xf32>
    %67 = vector.multi_reduction <maximumf>, %66, %cst_21 [2] : vector<1x8x8xf32> to vector<1x8xf32>
    %68 = vector.shape_cast %67 : vector<1x8xf32> to vector<1x8x1xf32>
    %69 = vector.broadcast %68 : vector<1x8x1xf32> to vector<1x8x8xf32>
    %70 = arith.subf %66, %69 : vector<1x8x8xf32>
    %71 = math.exp %70 : vector<1x8x8xf32>
    %cst_22 = arith.constant dense<0.000000e+00> : vector<1x8xf32>
    %72 = vector.multi_reduction <add>, %71, %cst_22 [2] : vector<1x8x8xf32> to vector<1x8xf32>
    %73 = vector.shape_cast %72 : vector<1x8xf32> to vector<1x8x1xf32>
    "tpu.trace_start"() <{level = 10 : i32, message = "bqk,bkd->bqd"}> : () -> ()
    %cst_23 = arith.constant dense<0.000000e+00> : vector<1x8x16xf32>
    %74 = tpu.matmul %71, %63, %cst_23 {dimension_numbers = #tpu.dot_dimension_numbers<[2], [1], [1], [2], [0, 0, 0, 1, 1, 2], [0], [0]>} : vector<1x8x8xf32>, vector<1x8x16xf32>, vector<1x8x16xf32> -> vector<1x8x16xf32>
    "tpu.trace_stop"() : () -> ()
    %75 = tpu.reciprocal %73 : vector<1x8x1xf32> -> vector<1x8x1xf32>
    %76 = vector.broadcast %75 : vector<1x8x1xf32> to vector<1x8x16xf32>
    %77 = arith.mulf %74, %76 : vector<1x8x16xf32>
    %78 = vector.extract_strided_slice %5 {offsets = [0, 0, 64], sizes = [1, 8, 16], strides = [1, 1, 1]} : vector<1x8x128xf32> to vector<1x8x16xf32>
    %79 = vector.extract_strided_slice %7 {offsets = [0, 0, 64], sizes = [1, 8, 16], strides = [1, 1, 1]} : vector<1x8x128xf32> to vector<1x8x16xf32>
    %80 = vector.extract_strided_slice %9 {offsets = [0, 0, 64], sizes = [1, 8, 16], strides = [1, 1, 1]} : vector<1x8x128xf32> to vector<1x8x16xf32>
    "tpu.trace_start"() <{level = 10 : i32, message = "bqd,bkd->bqk"}> : () -> ()
    %cst_24 = arith.constant dense<0.000000e+00> : vector<1x8x8xf32>
    %81 = tpu.matmul %78, %79, %cst_24 {dimension_numbers = #tpu.dot_dimension_numbers<[2], [2], [1], [1], [0, 0, 0, 1, 1, 1], [0], [0]>} : vector<1x8x16xf32>, vector<1x8x16xf32>, vector<1x8x8xf32> -> vector<1x8x8xf32>
    "tpu.trace_stop"() : () -> ()
    %cst_25 = arith.constant 2.500000e-01 : f32
    %82 = vector.broadcast %cst_25 : f32 to vector<1x8x8xf32>
    %83 = arith.mulf %81, %82 : vector<1x8x8xf32>
    %cst_26 = arith.constant dense<0xFF800000> : vector<1x8xf32>
    %84 = vector.multi_reduction <maximumf>, %83, %cst_26 [2] : vector<1x8x8xf32> to vector<1x8xf32>
    %85 = vector.shape_cast %84 : vector<1x8xf32> to vector<1x8x1xf32>
    %86 = vector.broadcast %85 : vector<1x8x1xf32> to vector<1x8x8xf32>
    %87 = arith.subf %83, %86 : vector<1x8x8xf32>
    %88 = math.exp %87 : vector<1x8x8xf32>
    %cst_27 = arith.constant dense<0.000000e+00> : vector<1x8xf32>
    %89 = vector.multi_reduction <add>, %88, %cst_27 [2] : vector<1x8x8xf32> to vector<1x8xf32>
    %90 = vector.shape_cast %89 : vector<1x8xf32> to vector<1x8x1xf32>
    "tpu.trace_start"() <{level = 10 : i32, message = "bqk,bkd->bqd"}> : () -> ()
    %cst_28 = arith.constant dense<0.000000e+00> : vector<1x8x16xf32>
    %91 = tpu.matmul %88, %80, %cst_28 {dimension_numbers = #tpu.dot_dimension_numbers<[2], [1], [1], [2], [0, 0, 0, 1, 1, 2], [0], [0]>} : vector<1x8x8xf32>, vector<1x8x16xf32>, vector<1x8x16xf32> -> vector<1x8x16xf32>
    "tpu.trace_stop"() : () -> ()
    %92 = tpu.reciprocal %90 : vector<1x8x1xf32> -> vector<1x8x1xf32>
    %93 = vector.broadcast %92 : vector<1x8x1xf32> to vector<1x8x16xf32>
    %94 = arith.mulf %91, %93 : vector<1x8x16xf32>
    %95 = vector.extract_strided_slice %5 {offsets = [0, 0, 80], sizes = [1, 8, 16], strides = [1, 1, 1]} : vector<1x8x128xf32> to vector<1x8x16xf32>
    %96 = vector.extract_strided_slice %7 {offsets = [0, 0, 80], sizes = [1, 8, 16], strides = [1, 1, 1]} : vector<1x8x128xf32> to vector<1x8x16xf32>
    %97 = vector.extract_strided_slice %9 {offsets = [0, 0, 80], sizes = [1, 8, 16], strides = [1, 1, 1]} : vector<1x8x128xf32> to vector<1x8x16xf32>
    "tpu.trace_start"() <{level = 10 : i32, message = "bqd,bkd->bqk"}> : () -> ()
    %cst_29 = arith.constant dense<0.000000e+00> : vector<1x8x8xf32>
    %98 = tpu.matmul %95, %96, %cst_29 {dimension_numbers = #tpu.dot_dimension_numbers<[2], [2], [1], [1], [0, 0, 0, 1, 1, 1], [0], [0]>} : vector<1x8x16xf32>, vector<1x8x16xf32>, vector<1x8x8xf32> -> vector<1x8x8xf32>
    "tpu.trace_stop"() : () -> ()
    %cst_30 = arith.constant 2.500000e-01 : f32
    %99 = vector.broadcast %cst_30 : f32 to vector<1x8x8xf32>
    %100 = arith.mulf %98, %99 : vector<1x8x8xf32>
    %cst_31 = arith.constant dense<0xFF800000> : vector<1x8xf32>
    %101 = vector.multi_reduction <maximumf>, %100, %cst_31 [2] : vector<1x8x8xf32> to vector<1x8xf32>
    %102 = vector.shape_cast %101 : vector<1x8xf32> to vector<1x8x1xf32>
    %103 = vector.broadcast %102 : vector<1x8x1xf32> to vector<1x8x8xf32>
    %104 = arith.subf %100, %103 : vector<1x8x8xf32>
    %105 = math.exp %104 : vector<1x8x8xf32>
    %cst_32 = arith.constant dense<0.000000e+00> : vector<1x8xf32>
    %106 = vector.multi_reduction <add>, %105, %cst_32 [2] : vector<1x8x8xf32> to vector<1x8xf32>
    %107 = vector.shape_cast %106 : vector<1x8xf32> to vector<1x8x1xf32>
    "tpu.trace_start"() <{level = 10 : i32, message = "bqk,bkd->bqd"}> : () -> ()
    %cst_33 = arith.constant dense<0.000000e+00> : vector<1x8x16xf32>
    %108 = tpu.matmul %105, %97, %cst_33 {dimension_numbers = #tpu.dot_dimension_numbers<[2], [1], [1], [2], [0, 0, 0, 1, 1, 2], [0], [0]>} : vector<1x8x8xf32>, vector<1x8x16xf32>, vector<1x8x16xf32> -> vector<1x8x16xf32>
    "tpu.trace_stop"() : () -> ()
    %109 = tpu.reciprocal %107 : vector<1x8x1xf32> -> vector<1x8x1xf32>
    %110 = vector.broadcast %109 : vector<1x8x1xf32> to vector<1x8x16xf32>
    %111 = arith.mulf %108, %110 : vector<1x8x16xf32>
    %112 = vector.extract_strided_slice %5 {offsets = [0, 0, 96], sizes = [1, 8, 16], strides = [1, 1, 1]} : vector<1x8x128xf32> to vector<1x8x16xf32>
    %113 = vector.extract_strided_slice %7 {offsets = [0, 0, 96], sizes = [1, 8, 16], strides = [1, 1, 1]} : vector<1x8x128xf32> to vector<1x8x16xf32>
    %114 = vector.extract_strided_slice %9 {offsets = [0, 0, 96], sizes = [1, 8, 16], strides = [1, 1, 1]} : vector<1x8x128xf32> to vector<1x8x16xf32>
    "tpu.trace_start"() <{level = 10 : i32, message = "bqd,bkd->bqk"}> : () -> ()
    %cst_34 = arith.constant dense<0.000000e+00> : vector<1x8x8xf32>
    %115 = tpu.matmul %112, %113, %cst_34 {dimension_numbers = #tpu.dot_dimension_numbers<[2], [2], [1], [1], [0, 0, 0, 1, 1, 1], [0], [0]>} : vector<1x8x16xf32>, vector<1x8x16xf32>, vector<1x8x8xf32> -> vector<1x8x8xf32>
    "tpu.trace_stop"() : () -> ()
    %cst_35 = arith.constant 2.500000e-01 : f32
    %116 = vector.broadcast %cst_35 : f32 to vector<1x8x8xf32>
    %117 = arith.mulf %115, %116 : vector<1x8x8xf32>
    %cst_36 = arith.constant dense<0xFF800000> : vector<1x8xf32>
    %118 = vector.multi_reduction <maximumf>, %117, %cst_36 [2] : vector<1x8x8xf32> to vector<1x8xf32>
    %119 = vector.shape_cast %118 : vector<1x8xf32> to vector<1x8x1xf32>
    %120 = vector.broadcast %119 : vector<1x8x1xf32> to vector<1x8x8xf32>
    %121 = arith.subf %117, %120 : vector<1x8x8xf32>
    %122 = math.exp %121 : vector<1x8x8xf32>
    %cst_37 = arith.constant dense<0.000000e+00> : vector<1x8xf32>
    %123 = vector.multi_reduction <add>, %122, %cst_37 [2] : vector<1x8x8xf32> to vector<1x8xf32>
    %124 = vector.shape_cast %123 : vector<1x8xf32> to vector<1x8x1xf32>
    "tpu.trace_start"() <{level = 10 : i32, message = "bqk,bkd->bqd"}> : () -> ()
    %cst_38 = arith.constant dense<0.000000e+00> : vector<1x8x16xf32>
    %125 = tpu.matmul %122, %114, %cst_38 {dimension_numbers = #tpu.dot_dimension_numbers<[2], [1], [1], [2], [0, 0, 0, 1, 1, 2], [0], [0]>} : vector<1x8x8xf32>, vector<1x8x16xf32>, vector<1x8x16xf32> -> vector<1x8x16xf32>
    "tpu.trace_stop"() : () -> ()
    %126 = tpu.reciprocal %124 : vector<1x8x1xf32> -> vector<1x8x1xf32>
    %127 = vector.broadcast %126 : vector<1x8x1xf32> to vector<1x8x16xf32>
    %128 = arith.mulf %125, %127 : vector<1x8x16xf32>
    %129 = vector.extract_strided_slice %5 {offsets = [0, 0, 112], sizes = [1, 8, 16], strides = [1, 1, 1]} : vector<1x8x128xf32> to vector<1x8x16xf32>
    %130 = vector.extract_strided_slice %7 {offsets = [0, 0, 112], sizes = [1, 8, 16], strides = [1, 1, 1]} : vector<1x8x128xf32> to vector<1x8x16xf32>
    %131 = vector.extract_strided_slice %9 {offsets = [0, 0, 112], sizes = [1, 8, 16], strides = [1, 1, 1]} : vector<1x8x128xf32> to vector<1x8x16xf32>
    "tpu.trace_start"() <{level = 10 : i32, message = "bqd,bkd->bqk"}> : () -> ()
    %cst_39 = arith.constant dense<0.000000e+00> : vector<1x8x8xf32>
    %132 = tpu.matmul %129, %130, %cst_39 {dimension_numbers = #tpu.dot_dimension_numbers<[2], [2], [1], [1], [0, 0, 0, 1, 1, 1], [0], [0]>} : vector<1x8x16xf32>, vector<1x8x16xf32>, vector<1x8x8xf32> -> vector<1x8x8xf32>
    "tpu.trace_stop"() : () -> ()
    %cst_40 = arith.constant 2.500000e-01 : f32
    %133 = vector.broadcast %cst_40 : f32 to vector<1x8x8xf32>
    %134 = arith.mulf %132, %133 : vector<1x8x8xf32>
    %cst_41 = arith.constant dense<0xFF800000> : vector<1x8xf32>
    %135 = vector.multi_reduction <maximumf>, %134, %cst_41 [2] : vector<1x8x8xf32> to vector<1x8xf32>
    %136 = vector.shape_cast %135 : vector<1x8xf32> to vector<1x8x1xf32>
    %137 = vector.broadcast %136 : vector<1x8x1xf32> to vector<1x8x8xf32>
    %138 = arith.subf %134, %137 : vector<1x8x8xf32>
    %139 = math.exp %138 : vector<1x8x8xf32>
    %cst_42 = arith.constant dense<0.000000e+00> : vector<1x8xf32>
    %140 = vector.multi_reduction <add>, %139, %cst_42 [2] : vector<1x8x8xf32> to vector<1x8xf32>
    %141 = vector.shape_cast %140 : vector<1x8xf32> to vector<1x8x1xf32>
    "tpu.trace_start"() <{level = 10 : i32, message = "bqk,bkd->bqd"}> : () -> ()
    %cst_43 = arith.constant dense<0.000000e+00> : vector<1x8x16xf32>
    %142 = tpu.matmul %139, %131, %cst_43 {dimension_numbers = #tpu.dot_dimension_numbers<[2], [1], [1], [2], [0, 0, 0, 1, 1, 2], [0], [0]>} : vector<1x8x8xf32>, vector<1x8x16xf32>, vector<1x8x16xf32> -> vector<1x8x16xf32>
    "tpu.trace_stop"() : () -> ()
    %143 = tpu.reciprocal %141 : vector<1x8x1xf32> -> vector<1x8x1xf32>
    %144 = vector.broadcast %143 : vector<1x8x1xf32> to vector<1x8x16xf32>
    %145 = arith.mulf %142, %144 : vector<1x8x16xf32>
    %146 = tpu.concatenate %26, %43, %60, %77, %94, %111, %128, %145 in 2 : vector<1x8x16xf32>, vector<1x8x16xf32>, vector<1x8x16xf32>, vector<1x8x16xf32>, vector<1x8x16xf32>, vector<1x8x16xf32>, vector<1x8x16xf32>, vector<1x8x16xf32> -> vector<1x8x128xf32>
    %147 = vector.shape_cast %146 : vector<1x8x128xf32> to vector<8x128xf32>
    %c0_44 = arith.constant 0 : index
    %c0_45 = arith.constant 0 : index
    %148 = vector.load %arg3[%c0_44, %c0_45] : memref<128x128xf32, #tpu.memory_space<vmem>>, vector<128x128xf32>
    %cst_46 = arith.constant dense<0.000000e+00> : vector<8x128xf32>
    %149 = tpu.matmul %147, %148, %cst_46 {dimension_numbers = #tpu.dot_dimension_numbers<[1], [0], [0], [1], [0, 0, 1, 1], [], []>} : vector<8x128xf32>, vector<128x128xf32>, vector<8x128xf32> -> vector<8x128xf32>
    %c0_47 = arith.constant 0 : index
    %c0_48 = arith.constant 0 : index
    %150 = vector.load %arg7[%c0_47, %c0_48] : memref<8x128xf32, #tpu.memory_space<vmem>>, vector<1x128xf32>
    %151 = vector.broadcast %150 : vector<1x128xf32> to vector<8x128xf32>
    %152 = arith.addf %149, %151 : vector<8x128xf32>
    %153 = vector.shape_cast %152 : vector<8x128xf32> to vector<1x8x128xf32>
    %154 = arith.addf %0, %153 : vector<1x8x128xf32>
    %cst_49 = arith.constant dense<0.000000e+00> : vector<1x128xf32>
    %155 = vector.multi_reduction <add>, %154, %cst_49 [1] : vector<1x8x128xf32> to vector<1x128xf32>
    %156 = vector.shape_cast %155 : vector<1x128xf32> to vector<1x1x128xf32>
    %cst_50 = arith.constant 8.000000e+00 : f32
    %157 = vector.broadcast %cst_50 : f32 to vector<1x1x128xf32>
    %158 = arith.divf %156, %157 : vector<1x1x128xf32>
    %159 = vector.broadcast %158 : vector<1x1x128xf32> to vector<1x8x128xf32>
    %160 = arith.subf %154, %159 : vector<1x8x128xf32>
    %161 = vector.broadcast %158 : vector<1x1x128xf32> to vector<1x8x128xf32>
    %162 = arith.subf %154, %161 : vector<1x8x128xf32>
    %163 = arith.mulf %160, %162 : vector<1x8x128xf32>
    %cst_51 = arith.constant dense<0.000000e+00> : vector<1x128xf32>
    %164 = vector.multi_reduction <add>, %163, %cst_51 [1] : vector<1x8x128xf32> to vector<1x128xf32>
    %165 = vector.shape_cast %164 : vector<1x128xf32> to vector<1x1x128xf32>
    %cst_52 = arith.constant 8.000000e+00 : f32
    %166 = vector.broadcast %cst_52 : f32 to vector<1x1x128xf32>
    %167 = arith.divf %165, %166 : vector<1x1x128xf32>
    %168 = vector.broadcast %158 : vector<1x1x128xf32> to vector<1x8x128xf32>
    %169 = arith.subf %154, %168 : vector<1x8x128xf32>
    %cst_53 = arith.constant 9.99999974E-6 : f32
    %170 = vector.broadcast %cst_53 : f32 to vector<1x1x128xf32>
    %171 = arith.addf %167, %170 : vector<1x1x128xf32>
    %172 = math.rsqrt %171 : vector<1x1x128xf32>
    %173 = vector.broadcast %172 : vector<1x1x128xf32> to vector<1x8x128xf32>
    %174 = arith.mulf %169, %173 : vector<1x8x128xf32>
    %c1 = arith.constant 1 : index
    %c0_54 = arith.constant 0 : index
    %175 = vector.load %arg7[%c1, %c0_54] : memref<8x128xf32, #tpu.memory_space<vmem>>, vector<1x128xf32>
    %176 = vector.shape_cast %175 : vector<1x128xf32> to vector<1x1x128xf32>
    %177 = vector.broadcast %176 : vector<1x1x128xf32> to vector<1x8x128xf32>
    %178 = arith.mulf %174, %177 : vector<1x8x128xf32>
    %c2 = arith.constant 2 : index
    %c0_55 = arith.constant 0 : index
    %179 = vector.load %arg7[%c2, %c0_55] : memref<8x128xf32, #tpu.memory_space<vmem>>, vector<1x128xf32>
    %180 = vector.shape_cast %179 : vector<1x128xf32> to vector<1x1x128xf32>
    %181 = vector.broadcast %180 : vector<1x1x128xf32> to vector<1x8x128xf32>
    %182 = arith.addf %178, %181 : vector<1x8x128xf32>
    %183 = vector.shape_cast %182 : vector<1x8x128xf32> to vector<8x128xf32>
    %c0_56 = arith.constant 0 : index
    %c0_57 = arith.constant 0 : index
    %184 = vector.load %arg4[%c0_56, %c0_57] : memref<128x512xf32, #tpu.memory_space<vmem>>, vector<128x512xf32>
    %cst_58 = arith.constant dense<0.000000e+00> : vector<8x512xf32>
    %185 = tpu.matmul %183, %184, %cst_58 {dimension_numbers = #tpu.dot_dimension_numbers<[1], [0], [0], [1], [0, 0, 1, 1], [], []>} : vector<8x128xf32>, vector<128x512xf32>, vector<8x512xf32> -> vector<8x512xf32>
    %c0_59 = arith.constant 0 : index
    %c0_60 = arith.constant 0 : index
    %186 = vector.load %arg6[%c0_59, %c0_60] : memref<1x512xf32, #tpu.memory_space<vmem>>, vector<1x512xf32>
    %187 = vector.broadcast %186 : vector<1x512xf32> to vector<8x512xf32>
    %188 = arith.addf %185, %187 : vector<8x512xf32>
    %cst_61 = arith.constant 0.000000e+00 : f32
    %189 = vector.broadcast %cst_61 : f32 to vector<8x512xf32>
    %190 = arith.maximumf %188, %189 : vector<8x512xf32>
    %c0_62 = arith.constant 0 : index
    %c0_63 = arith.constant 0 : index
    %191 = vector.load %arg5[%c0_62, %c0_63] : memref<512x128xf32, #tpu.memory_space<vmem>>, vector<512x128xf32>
    %cst_64 = arith.constant dense<0.000000e+00> : vector<8x128xf32>
    %192 = tpu.matmul %190, %191, %cst_64 {dimension_numbers = #tpu.dot_dimension_numbers<[1], [0], [0], [1], [0, 0, 1, 1], [], []>} : vector<8x512xf32>, vector<512x128xf32>, vector<8x128xf32> -> vector<8x128xf32>
    %c3 = arith.constant 3 : index
    %c0_65 = arith.constant 0 : index
    %193 = vector.load %arg7[%c3, %c0_65] : memref<8x128xf32, #tpu.memory_space<vmem>>, vector<1x128xf32>
    %194 = vector.broadcast %193 : vector<1x128xf32> to vector<8x128xf32>
    %195 = arith.addf %192, %194 : vector<8x128xf32>
    %196 = vector.shape_cast %195 : vector<8x128xf32> to vector<1x8x128xf32>
    %197 = arith.addf %182, %196 : vector<1x8x128xf32>
    %cst_66 = arith.constant dense<0.000000e+00> : vector<1x128xf32>
    %198 = vector.multi_reduction <add>, %197, %cst_66 [1] : vector<1x8x128xf32> to vector<1x128xf32>
    %199 = vector.shape_cast %198 : vector<1x128xf32> to vector<1x1x128xf32>
    %cst_67 = arith.constant 8.000000e+00 : f32
    %200 = vector.broadcast %cst_67 : f32 to vector<1x1x128xf32>
    %201 = arith.divf %199, %200 : vector<1x1x128xf32>
    %202 = vector.broadcast %201 : vector<1x1x128xf32> to vector<1x8x128xf32>
    %203 = arith.subf %197, %202 : vector<1x8x128xf32>
    %204 = vector.broadcast %201 : vector<1x1x128xf32> to vector<1x8x128xf32>
    %205 = arith.subf %197, %204 : vector<1x8x128xf32>
    %206 = arith.mulf %203, %205 : vector<1x8x128xf32>
    %cst_68 = arith.constant dense<0.000000e+00> : vector<1x128xf32>
    %207 = vector.multi_reduction <add>, %206, %cst_68 [1] : vector<1x8x128xf32> to vector<1x128xf32>
    %208 = vector.shape_cast %207 : vector<1x128xf32> to vector<1x1x128xf32>
    %cst_69 = arith.constant 8.000000e+00 : f32
    %209 = vector.broadcast %cst_69 : f32 to vector<1x1x128xf32>
    %210 = arith.divf %208, %209 : vector<1x1x128xf32>
    %211 = vector.broadcast %201 : vector<1x1x128xf32> to vector<1x8x128xf32>
    %212 = arith.subf %197, %211 : vector<1x8x128xf32>
    %cst_70 = arith.constant 9.99999974E-6 : f32
    %213 = vector.broadcast %cst_70 : f32 to vector<1x1x128xf32>
    %214 = arith.addf %210, %213 : vector<1x1x128xf32>
    %215 = math.rsqrt %214 : vector<1x1x128xf32>
    %216 = vector.broadcast %215 : vector<1x1x128xf32> to vector<1x8x128xf32>
    %217 = arith.mulf %212, %216 : vector<1x8x128xf32>
    %c4 = arith.constant 4 : index
    %c0_71 = arith.constant 0 : index
    %218 = vector.load %arg7[%c4, %c0_71] : memref<8x128xf32, #tpu.memory_space<vmem>>, vector<1x128xf32>
    %219 = vector.shape_cast %218 : vector<1x128xf32> to vector<1x1x128xf32>
    %220 = vector.broadcast %219 : vector<1x1x128xf32> to vector<1x8x128xf32>
    %221 = arith.mulf %217, %220 : vector<1x8x128xf32>
    %c5 = arith.constant 5 : index
    %c0_72 = arith.constant 0 : index
    %222 = vector.load %arg7[%c5, %c0_72] : memref<8x128xf32, #tpu.memory_space<vmem>>, vector<1x128xf32>
    %223 = vector.shape_cast %222 : vector<1x128xf32> to vector<1x1x128xf32>
    %224 = vector.broadcast %223 : vector<1x1x128xf32> to vector<1x8x128xf32>
    %225 = arith.addf %221, %224 : vector<1x8x128xf32>
    %c0_73 = arith.constant 0 : index
    %c0_74 = arith.constant 0 : index
    %c0_75 = arith.constant 0 : index
    %226 = vector.load %arg8[%c0_73, %c0_74, %c0_75] : memref<1x8x128xf32, #tpu.memory_space<vmem>>, vector<1x8x128xf32>
    tpu.vector_store %arg8[%c0_73, %c0_74, %c0_75], %225 {strides = array<i32>} : memref<1x8x128xf32, #tpu.memory_space<vmem>>, vector<1x8x128xf32>,
    return
  }
  func.func @transform_0(%arg0: i32) -> (i32, i32, i32) {
    %c0_i32 = arith.constant 0 : i32
    %c0_i32_0 = arith.constant 0 : i32
    %c0_i32_1 = arith.constant 0 : i32
    return %arg0, %c0_i32, %c0_i32_0 : i32, i32, i32
  }
  func.func @transform_1(%arg0: i32) -> (i32, i32) {
    %c0_i32 = arith.constant 0 : i32
    %c0_i32_0 = arith.constant 0 : i32
    %c0_i32_1 = arith.constant 0 : i32
    return %c0_i32, %c0_i32_0 : i32, i32
  }
  func.func @transform_2(%arg0: i32) -> (i32, i32) {
    %c0_i32 = arith.constant 0 : i32
    %c0_i32_0 = arith.constant 0 : i32
    %c0_i32_1 = arith.constant 0 : i32
    return %c0_i32, %c0_i32_0 : i32, i32
  }
  func.func @transform_3(%arg0: i32) -> (i32, i32) {
    %c0_i32 = arith.constant 0 : i32
    %c0_i32_0 = arith.constant 0 : i32
    %c0_i32_1 = arith.constant 0 : i32
    return %c0_i32, %c0_i32_0 : i32, i32
  }
  func.func @transform_4(%arg0: i32) -> (i32, i32) {
    %c0_i32 = arith.constant 0 : i32
    %c0_i32_0 = arith.constant 0 : i32
    %c0_i32_1 = arith.constant 0 : i32
    return %c0_i32, %c0_i32_0 : i32, i32
  }
  func.func @transform_5(%arg0: i32) -> (i32, i32) {
    %c0_i32 = arith.constant 0 : i32
    %c0_i32_0 = arith.constant 0 : i32
    %c0_i32_1 = arith.constant 0 : i32
    return %c0_i32, %c0_i32_0 : i32, i32
  }
  func.func @transform_6(%arg0: i32) -> (i32, i32) {
    %c0_i32 = arith.constant 0 : i32
    %c0_i32_0 = arith.constant 0 : i32
    %c0_i32_1 = arith.constant 0 : i32
    return %c0_i32, %c0_i32_0 : i32, i32
  }
  func.func @transform_7(%arg0: i32) -> (i32, i32, i32) {
    %c0_i32 = arith.constant 0 : i32
    %c0_i32_0 = arith.constant 0 : i32
    %c0_i32_1 = arith.constant 0 : i32
    return %arg0, %c0_i32, %c0_i32_0 : i32, i32, i32
  }
}

</mosaic_0001>

<bundles_post_ra>
// kernel: encoder_layer_forward.1
= control target key start
LH: loop header
LB: loop body
LE: loop exit
PB: predicated region body
PF: predicated region fallthrough
CT: control target
= control target key end

     0   :  { %12 = vsyncpa [#allocation3], 0  ;;  %s3913_s0 = inlined_call_operand.vmem [shape: f32[2,8,128], index: 0, kind: input, shape index: {}]   ;;  %s3914_s1 = inlined_call_operand.vmem [shape: f32[128,384], index: 1, kind: input, shape index: {}]   ;;  %s3915_s2 = inlined_call_operand.vmem [shape: f32[128,128], index: 2, kind: input, shape index: {}]   ;;  %s3916_s3 = inlined_call_operand.vmem [shape: f32[128,512], index: 3, kind: input, shape index: {}]   ;;  %s3917_s4 = inlined_call_operand.vmem [shape: f32[512,128], index: 4, kind: input, shape index: {}]   ;;  %s3918_s5 = inlined_call_operand.vmem [shape: f32[1,512], index: 5, kind: input, shape index: {}]   ;;  %s3919_s6 = inlined_call_operand.vmem [shape: f32[8,128], index: 6, kind: input, shape index: {}]   ;;  %s3920_s7 = inlined_call_operand.hbm [shape: f32[2,8,128], index: 7, kind: output, shape index: {}]  }
   0x1   :  { %14 = vsyncpa [#allocation3 + $0x1], 0  ;;  %s3024_s24 = smov 0   ;;  %s3026_s25 = smov 0  }
   0x2   :  { %s3028_s26 = smov 0   ;;  %s3030_s27 = smov 0  }
   0x3 LB: > { %s3045_s28 = sadd.s32 4294967295, %s2972_s27   ;;  %s2502_s29 = sadd.s32 4294967294, %s2972_s27   ;;  %s2972_s27 = sphi %s3030_s27, %s3926_s27   ;;  %s2968_s26 = sphi %s3028_s26, %s3925_s26   ;;  %s2964_s25 = sphi %s3026_s25, %s3924_s25   ;;  %s2960_s24 = sphi %s3024_s24, %s3923_s24  }
   0x4   : > { %s3049_s30 = sadd.s32 1, %s2972_s27   ;;  %s179_s8 = sadd.s32 1, %s2968_s26 }
   0x5   : > { %s176_s9 = ssub.s32 %s2972_s27, %s3049_s30  ;;  %p189_p0 = scmp.ne.s32.totalorder %s2968_s26, %s2964_s25 }
   0x6   : > { %p177_p1 = scmp.eq.s32.totalorder %s176_s9, 0  ;;  %p190_p2 = scmp.eq.s32.totalorder %s3045_s28, 1 }
   0x7   : > { %p195_p3 = scmp.ne.s32.totalorder %s2964_s25, %s2960_s24  ;;  %p196_p4 = scmp.eq.s32.totalorder %s2502_s29, 1 }
   0x8   : > { %s3060_s10 = scalar_select %p177_p1, %s2968_s26, %s179_s8  }
   0x9   : > { %p3062_p5 = por %p190_p2, %p189_p0  ;;  %p3066_p6 = por %p196_p4, %p195_p3 }
   0xa   : > { %p2505_p7 = scmp.ge.s32.totalorder %s2972_s27, 1  ;;  %p239_p8 = scmp.lt.s32.totalorder %s2972_s27, 3 }
   0xc   : > { %p240_p9 = pnand %p2505_p7, %p239_p8 }
   0xd   : > { %p270_p10 = scmp.lt.s32.totalorder (!%p240_p9), %s3045_s28, 1  ;;  %s2976_s18 = smov (!%p240_p9), 112  }
   0xe   : > { %243 = sbr.rel (%p240_p9) target bundleno = 2718 (0xa9e), region = 48  ;;  %s2977_s19 = smov (!%p240_p9), 96  }
   0xf   : > { %s2979_s20 = smov (!%p240_p9), 64   ;;  %s2980_s21 = smov (!%p240_p9), 48  }
  0x10   : > { %s2982_s22 = smov (!%p240_p9), 16   ;;  %s2539_s17 = sshll.u32 (!%p240_p9), %s3045_s28, 7 }
  0x13   : > { %v321_v0 = vld [vmem:[%s3914_s1 + $0x170] sm:$0xff]  ;;  %v320_v1 = vld [vmem:[%s3914_s1 + $0x168] sm:$0xff]  ;;  %v318_v2 = vld [vmem:[%s3914_s1 + $0x158] sm:$0xff]  ;;  %v2974_v4 = vmov 0.0   ;;  %s271_s15 = scalar_select %p270_p10, %s3045_s28, 1  ;;  %vm2975_vm0 = vmmov 0  }
  0x14   : > { %323 = vmatprep.subr.mxu0 %v321_v0  ;;  %v317_v3 = vld [vmem:[%s3914_s1 + $0x150] sm:$0xff]  ;;  %387 = vmatprep.mubr.f32.mxu0 %v2974_v4  ;;  %v315_v5 = vld [vmem:[%s3914_s1 + $0x140] sm:$0xff]  ;;  %v314_v6 = vld [vmem:[%s3914_s1 + $0x138] sm:$0xff]  ;;  %vm464_vm1 = vcmask 130048   ;;  %vm542_vm2 = vcmask 64512   ;;  %vm1819_vm3 = vcmask 261120  }
  0x15   : > { %324 = vmatpush1.msra.mxu0 %v320_v1  ;;  %2678 = vmatprep.subr.mxu1 %v2974_v4  ;;  %v312_v7 = vld [vmem:[%s3914_s1 + $0x128] sm:$0xff]  ;;  %v311_v8 = vld [vmem:[%s3914_s1 + $0x120] sm:$0xff]  ;;  %v309_v9 = vld [vmem:[%s3914_s1 + $0x110] sm:$0xff]  ;;  %s2507_s14 = sshll.u32 %s271_s15, 3  ;;  %s2981_s15 = smov 32   ;;  %vm1821_vm4 = vcmask 392192  }
  0x16   : > { %325 = vmatprep.subr.mxu0 %v318_v2  ;;  %v308_v10 = vld [vmem:[%s3914_s1 + $0x108] sm:$0xff]  ;;  %v306_v11 = vld [vmem:[%s3914_s1 + $0xf8] sm:$0xff]  ;;  %v305_v12 = vld [vmem:[%s3914_s1 + $0xf0] sm:$0xff]  ;;  %s273_s8 = scalar_lea.vmem %s3913_s0, %s2507_s14  ;;  %2710 = vmatprep.mubr.msk.f32.mxu1 %vm2975_vm0, %v2974_v4  ;;  %s2978_s14 = smov 80   ;;  %vm1823_vm5 = vcmask 523264   ;;  %vm1825_vm6 = vcmask 654336  }
  0x17   : > { %326 = vmatpush1.msra.mxu0 %v317_v3  ;;  %v303_v13 = vld [vmem:[%s3914_s1 + $0xe0] sm:$0xff]  ;;  %v302_v14 = vld [vmem:[%s3914_s1 + $0xd8] sm:$0xff]  ;;  %v300_v17 = vld [vmem:[%s3914_s1 + $0xc8] sm:$0xff]  ;;  %vm1827_vm7 = vcmask 785408   ;;  %vm1829_vm8 = vcmask 916480  }
  0x18   : > { %327 = vmatprep.subr.mxu0 %v315_v5  ;;  %v322_v15 = vld [vmem:[%s3914_s1 + $0x178] sm:$0xff]  ;;  %v319_v16 = vld [vmem:[%s3914_s1 + $0x160] sm:$0xff]  ;;  %v316_v19 = vld [vmem:[%s3914_s1 + $0x148] sm:$0xff] }
  0x19   : > { %328 = vmatpush1.msra.mxu0 %v314_v6  ;;  %2679 = vmatpush3.msra.mxu1 %v322_v15  ;;  %v299_v18 = vld [vmem:[%s3914_s1 + $0xc0] sm:$0xff]  ;;  %v297_v20 = vld [vmem:[%s3914_s1 + $0xb0] sm:$0xff]  ;;  %v296_v21 = vld [vmem:[%s3914_s1 + $0xa8] sm:$0xff] }
  0x1a   : > { %329 = vmatprep.subr.mxu0 %v312_v7  ;;  %2680 = vmatprep.subr.mxu1 %v2974_v4  ;;  %v313_v22 = vld [vmem:[%s3914_s1 + $0x130] sm:$0xff]  ;;  %v294_v23 = vld [vmem:[%s3914_s1 + $0x98] sm:$0xff]  ;;  %v291_v26 = vld [vmem:[%s3914_s1 + $0x80] sm:$0xff] }
  0x1b   : > { %330 = vmatpush1.msra.mxu0 %v311_v8  ;;  %2681 = vmatpush3.msra.mxu1 %v319_v16  ;;  %v293_v24 = vld [vmem:[%s3914_s1 + $0x90] sm:$0xff]  ;;  %v310_v25 = vld [vmem:[%s3914_s1 + $0x118] sm:$0xff]  ;;  %v307_v28 = vld [vmem:[%s3914_s1 + $0x100] sm:$0xff] }
  0x1c   : > { %331 = vmatprep.subr.mxu0 %v309_v9  ;;  %2682 = vmatprep.subr.mxu1 %v2974_v4  ;;  %v290_v27 = vld [vmem:[%s3914_s1 + $0x78] sm:$0xff]  ;;  %v288_v29 = vld [vmem:[%s3914_s1 + $0x68] sm:$0xff]  ;;  %v287_v30 = vld [vmem:[%s3914_s1 + $0x60] sm:$0xff] }
  0x1d   : > { %332 = vmatpush1.msra.mxu0 %v308_v10  ;;  %2683 = vmatpush3.msra.mxu1 %v316_v19  ;;  %v304_v31 = vld [vmem:[%s3914_s1 + $0xe8] sm:$0xff]  ;;  %v285_v32 = vld [vmem:[%s3914_s1 + $0x50] sm:$0xff]  ;;  %v282_v35 = vld [vmem:[%s3914_s1 + $0x38] sm:$0xff] }
  0x1e   : > { %333 = vmatprep.subr.mxu0 %v306_v11  ;;  %2684 = vmatprep.subr.mxu1 %v2974_v4  ;;  %v284_v33 = vld [vmem:[%s3914_s1 + $0x48] sm:$0xff]  ;;  %v301_v34 = vld [vmem:[%s3914_s1 + $0xd0] sm:$0xff]  ;;  %v298_v37 = vld [vmem:[%s3914_s1 + $0xb8] sm:$0xff] }
  0x1f   : > { %334 = vmatpush1.msra.mxu0 %v305_v12  ;;  %2685 = vmatpush3.msra.mxu1 %v313_v22  ;;  %v281_v36 = vld [vmem:[%s3914_s1 + $0x30] sm:$0xff]  ;;  %v279_v38 = vld [vmem:[%s3914_s1 + $0x20] sm:$0xff]  ;;  %v278_v39 = vld [vmem:[%s3914_s1 + $0x18] sm:$0xff] }
  0x20   : > { %335 = vmatprep.subr.mxu0 %v303_v13  ;;  %2686 = vmatprep.subr.mxu1 %v2974_v4  ;;  %v295_v40 = vld [vmem:[%s3914_s1 + $0xa0] sm:$0xff]  ;;  %v276_v41 = vld [vmem:[%s3914_s1 + $0x8] sm:$0xff]  ;;  %v289_v45 = vld [vmem:[%s3914_s1 + $0x70] sm:$0xff] }
  0x21   : > { %336 = vmatpush1.msra.mxu0 %v302_v14  ;;  %2687 = vmatpush3.msra.mxu1 %v310_v25  ;;  %v275_v42 = vld [vmem:[%s3914_s1] sm:$0xff]  ;;  %v292_v43 = vld [vmem:[%s3914_s1 + $0x88] sm:$0xff]  ;;  %v286_v46 = vld [vmem:[%s3914_s1 + $0x58] sm:$0xff] }
  0x22   : > { %337 = vmatprep.subr.mxu0 %v300_v17  ;;  %2688 = vmatprep.subr.mxu1 %v2974_v4  ;;  %v3219_v44 = vld [vmem:[%s273_s8] sm:$0xff]  ;;  %v280_v48 = vld [vmem:[%s3914_s1 + $0x28] sm:$0xff]  ;;  %v277_v49 = vld [vmem:[%s3914_s1 + $0x10] sm:$0xff]  ;;  %s2441_s8 = scalar_lea.hbm %s3920_s7, %s2539_s17 }
  0x23   : > { %338 = vmatpush1.msra.mxu0 %v299_v18  ;;  %2689 = vmatpush3.msra.mxu1 %v307_v28  ;;  %v283_v47 = vld [vmem:[%s3914_s1 + $0x40] sm:$0xff] }
  0x24   : > { %339 = vmatprep.subr.mxu0 %v297_v20  ;;  %2690 = vmatprep.subr.mxu1 %v2974_v4 }
  0x25   : > { %340 = vmatpush1.msra.mxu0 %v296_v21  ;;  %2691 = vmatpush3.msra.mxu1 %v304_v31 }
  0x26   : > { %341 = vmatprep.subr.mxu0 %v294_v23  ;;  %2692 = vmatprep.subr.mxu1 %v2974_v4 }
  0x27   : > { %342 = vmatpush1.msra.mxu0 %v293_v24  ;;  %2693 = vmatpush3.msra.mxu1 %v301_v34 }
  0x28   : > { %343 = vmatprep.subr.mxu0 %v291_v26  ;;  %2694 = vmatprep.subr.mxu1 %v2974_v4 }
  0x29   : > { %344 = vmatpush1.msra.mxu0 %v290_v27  ;;  %2695 = vmatpush3.msra.mxu1 %v298_v37 }
  0x2a   : > { %345 = vmatprep.subr.mxu0 %v288_v29  ;;  %2696 = vmatprep.subr.mxu1 %v2974_v4 }
  0x2b   : > { %346 = vmatpush1.msra.mxu0 %v287_v30  ;;  %2697 = vmatpush3.msra.mxu1 %v295_v40 }
  0x2c   : > { %347 = vmatprep.subr.mxu0 %v285_v32  ;;  %2698 = vmatprep.subr.mxu1 %v2974_v4 }
  0x2d   : > { %348 = vmatpush1.msra.mxu0 %v284_v33  ;;  %2699 = vmatpush3.msra.mxu1 %v292_v43 }
  0x2e   : > { %349 = vmatprep.subr.mxu0 %v282_v35  ;;  %2700 = vmatprep.subr.mxu1 %v2974_v4 }
  0x2f   : > { %350 = vmatpush1.msra.mxu0 %v281_v36  ;;  %2701 = vmatpush3.msra.mxu1 %v289_v45 }
  0x30   : > { %351 = vmatprep.subr.mxu0 %v279_v38  ;;  %2702 = vmatprep.subr.mxu1 %v2974_v4 }
  0x31   : > { %352 = vmatpush1.msra.mxu0 %v278_v39  ;;  %2703 = vmatpush3.msra.mxu1 %v286_v46 }
  0x32   : > { %353 = vmatprep.subr.mxu0 %v276_v41  ;;  %2704 = vmatprep.subr.mxu1 %v2974_v4 }
  0x33   : > { %354 = vmatpush1.msra.mxu0 %v275_v42  ;;  %2705 = vmatpush3.msra.mxu1 %v283_v47 }
  0x34   : > { %388 = vmatmul.mubr.f32.vlgmr.msra.gmra.mxu0 %v3219_v44  ;;  %2753 = vmatprep.subr.mxu0 %v2974_v4 }
  0x35   : > { %2706 = vmatprep.subr.mxu1 %v2974_v4  ;;  %2755 = vmatprep.mubr.msk.f32.mxu0 %vm2975_vm0, %v2974_v4 }
  0x36   : > { %2707 = vmatpush3.msra.mxu1 %v280_v48 }
  0x37   : > { %2708 = vmatprep.subr.mxu1 %v2974_v4 }
  0x38   : > { %2709 = vmatpush3.msra.mxu1 %v277_v49 }
  0x39   : > { %2711 = vmatmul.mubr.f32.vlgmr.msra.gmra.mxu1 %v3219_v44  ;;  %2713 = vmatprep.subr.mxu1 %v2974_v4 }
  0x3a   : > { %2715 = vmatprep.mubr.msk.f32.mxu1 %vm2975_vm0, %v2974_v4 }
  0xf4   : > { %v3252_v50 = vpop.f32.mrf.mxu0 }
  0xf5   : > { %627 = vrot.lane.b32.xlu1 %v3252_v50, %s2976_s18 }
  0xf6   : > { %v391_v51 = vpop.f32.mrf.mxu0 }
  0xf7   : > { %2714 = vmatpush3.xpose.msk.msra.mxu1 %vm464_vm1, %v391_v51 }
  0xf8   : > { %2718 = vmatprep.subr.mxu1 %v2974_v4 }
  0xf9   : > { %v3262_v52 = vpop.f32.mrf.mxu1 }
  0xfa   : > { %2716 = vmatmul.mubr.msk.f32.vlgmr.msra.gmra.mxu1 %vm464_vm1, %v3252_v50 }
  0xfb   : > { %2720 = vmatprep.mubr.msk.f32.mxu1 %vm2975_vm0, %v2974_v4  ;;  %2719 = vmatpush3.msra.mxu1 %v3262_v52  ;;  %v2712_v53 = vpop.f32.mrf.mxu1 }
  0xfc   : > { %2723 = vmatprep.subr.mxu1 %v2974_v4 }
 0x167   : > { %v628_v63 = vpop.permute.xlu1 %627 }
 0x1ba   : > { %v537_v54 = vpop.f32.mrf.mxu1 }
 0x1bb   : > { %v541_v55 = vmul.f32 0.25, %v537_v54 }
 0x1bc   : > { %v2717_v56 = vpop.f32.mrf.mxu1 }
 0x1bd   : > { %v543_v57 = vsel %vm542_vm2, %v541_v55, -inf }
 0x1be   : > { %544 = vmax.xlane.f32.xlu0 %v543_v57 }
 0x1d4   : > { %629 = vrot.lane.b32.xlu0 %v391_v51, %s2976_s18 }
 0x1d8   : > { %716 = vrot.lane.b32.xlu0 %v3262_v52, %s2976_s18 }
 0x1dc   : > { %796 = vrot.lane.b32.xlu0 %v391_v51, %s2977_s19 }
 0x1e0   : > { %794 = vrot.lane.b32.xlu0 %v3252_v50, %s2977_s19 }
 0x247   : > { %v545_v58 = vpop.xlane.xlu0 %544 }
 0x248   : > { %v546_v59 = vsub.f32 %v541_v55, %v545_v58 }
 0x24a   : > { %v547_v60 = vmul.f32 1.442695, %v546_v59 }
 0x24b   : > { %v630_v61 = vpop.permute.xlu0 %629 }
 0x24c   : > { %2876 = vpow2.f32 %v547_v60 }
 0x24f   : > { %v717_v0 = vpop.permute.xlu0 %716 }
 0x253   : > { %v797_v14 = vpop.permute.xlu0 %796 }
 0x257   : > { %v795_v17 = vpop.permute.xlu0 %794 }
 0x259   : > { %v3273_v62 = vpop.eup %2876 }
 0x25a   : > { %2721 = vmatmul.mubr.msk.f32.vlgmr.msra.gmra.mxu1 %vm542_vm2, %v3273_v62 }
 0x25b   : > { %2724 = vmatpush3.xpose.msk.msra.mxu1 %vm464_vm1, %v630_v61  ;;  %2725 = vmatprep.mubr.msk.f32.mxu1 %vm2975_vm0, %v2974_v4 }
 0x25c   : > { %2728 = vmatprep.subr.mxu1 %v2974_v4 }
 0x25e   : > { %2726 = vmatmul.mubr.msk.f32.vlgmr.msra.gmra.mxu1 %vm464_vm1, %v628_v63 }
 0x25f   : > { %2729 = vmatpush3.msra.mxu1 %v717_v0  ;;  %2730 = vmatprep.mubr.msk.f32.mxu1 %vm2975_vm0, %v2974_v4 }
 0x260   : > { %2733 = vmatprep.subr.mxu1 %v2974_v4 }
 0x31a   : > { %v3285_v1 = vpop.f32.mrf.mxu1 }
 0x31c   : > { %v2722_v2 = vpop.f32.mrf.mxu1 }
 0x31e   : > { %v701_v3 = vpop.f32.mrf.mxu1 }
 0x31f   : > { %v705_v5 = vmul.f32 0.25, %v701_v3 }
 0x320   : > { %v2727_v6 = vpop.f32.mrf.mxu1 }
 0x321   : > { %v706_v7 = vsel %vm542_vm2, %v705_v5, -inf }
 0x322   : > { %707 = vmax.xlane.f32.xlu1 %v706_v7 }
 0x333   : > { %882 = vrot.lane.b32.xlu1 %v3262_v52, %s2977_s19 }
 0x337   : > { %962 = vrot.lane.b32.xlu1 %v391_v51, %s2978_s14 }
 0x33b   : > { %960 = vrot.lane.b32.xlu1 %v3252_v50, %s2978_s14 }
 0x33f   : > { %1128 = vrot.lane.b32.xlu1 %v391_v51, %s2979_s20 }
 0x343   : > { %1294 = vrot.lane.b32.xlu1 %v391_v51, %s2980_s21 }
 0x347   : > { %1292 = vrot.lane.b32.xlu1 %v3252_v50, %s2980_s21 }
 0x34b   : > { %1460 = vrot.lane.b32.xlu1 %v391_v51, %s2981_s15 }
 0x34f   : > { %1458 = vrot.lane.b32.xlu1 %v3252_v50, %s2981_s15 }
 0x353   : > { %1626 = vrot.lane.b32.xlu1 %v391_v51, %s2982_s22 }
 0x357   : > { %1624 = vrot.lane.b32.xlu1 %v3252_v50, %s2982_s22 }
 0x3ab   : > { %v708_v8 = vpop.xlane.xlu1 %707 }
 0x3ac   : > { %v709_v9 = vsub.f32 %v705_v5, %v708_v8 }
 0x3ae   : > { %v710_v10 = vmul.f32 1.442695, %v709_v9 }
 0x3af   : > { %v883_v11 = vpop.permute.xlu1 %882 }
 0x3b0   : > { %2878 = vpow2.f32 %v710_v10 }
 0x3b3   : > { %v963_v12 = vpop.permute.xlu1 %962 }
 0x3b7   : > { %v961_v13 = vpop.permute.xlu1 %960 }
 0x3bb   : > { %v1129_v15 = vpop.permute.xlu1 %1128 }
 0x3bc   : > { %2754 = vmatpush3.xpose.msk.msra.mxu0 %vm464_vm1, %v1129_v15 }
 0x3bd   : > { %v3304_v16 = vpop.eup %2878  ;;  %2763 = vmatprep.subr.mxu0 %v2974_v4 }
 0x3be   : > { %2731 = vmatmul.mubr.msk.f32.vlgmr.msra.gmra.mxu1 %vm542_vm2, %v3304_v16  ;;  %v712_v60 = vsel %vm542_vm2, %v3304_v16, 0.0 }
 0x3bf   : > { %2734 = vmatpush3.xpose.msk.msra.mxu1 %vm464_vm1, %v797_v14  ;;  %2735 = vmatprep.mubr.msk.f32.mxu1 %vm2975_vm0, %v2974_v4  ;;  %v1295_v24 = vpop.permute.xlu1 %1294 }
 0x3c0   : > { %2738 = vmatprep.subr.mxu1 %v2974_v4 }
 0x3c2   : > { %2736 = vmatmul.mubr.msk.f32.vlgmr.msra.gmra.mxu1 %vm464_vm1, %v795_v17 }
 0x3c3   : > { %2739 = vmatpush3.msra.mxu1 %v883_v11  ;;  %2740 = vmatprep.mubr.msk.f32.mxu1 %vm2975_vm0, %v2974_v4  ;;  %v1293_v25 = vpop.permute.xlu1 %1292 }
 0x3c4   : > { %2743 = vmatprep.subr.mxu1 %v2974_v4 }
 0x3c7   : > { %v1461_v26 = vpop.permute.xlu1 %1460 }
 0x3cb   : > { %v1459_v30 = vpop.permute.xlu1 %1458 }
 0x3cf   : > { %v1627_v32 = vpop.permute.xlu1 %1626 }
 0x3d3   : > { %v1625_v33 = vpop.permute.xlu1 %1624 }
 0x47e   : > { %v3317_v18 = vpop.f32.mrf.mxu1 }
 0x480   : > { %v2732_v19 = vpop.f32.mrf.mxu1 }
 0x482   : > { %v868_v20 = vpop.f32.mrf.mxu1 }
 0x483   : > { %v872_v21 = vmul.f32 0.25, %v868_v20 }
 0x484   : > { %v2737_v22 = vpop.f32.mrf.mxu1 }
 0x485   : > { %v873_v23 = vsel %vm542_vm2, %v872_v21, -inf }
 0x486   : > { %874 = vmax.xlane.f32.xlu0 %v873_v23 }
 0x49c   : > { %1126 = vrot.lane.b32.xlu0 %v3252_v50, %s2979_s20 }
 0x50f   : > { %v875_v27 = vpop.xlane.xlu0 %874 }
 0x510   : > { %v876_v28 = vsub.f32 %v872_v21, %v875_v27 }
 0x512   : > { %v877_v29 = vmul.f32 1.442695, %v876_v28 }
 0x513   : > { %v1127_v31 = vpop.permute.xlu0 %1126 }
 0x514   : > { %2880 = vpow2.f32 %v877_v29  ;;  %2756 = vmatmul.mubr.msk.f32.vlgmr.msra.gmra.mxu0 %vm464_vm1, %v1127_v31  ;;  %v549_v29 = vsel %vm542_vm2, %v3273_v62, 0.0 }
 0x515   : > { %2764 = vmatpush3.xpose.msk.msra.mxu0 %vm464_vm1, %v1295_v24  ;;  %2765 = vmatprep.mubr.msk.f32.mxu0 %vm2975_vm0, %v2974_v4 }
 0x516   : > { %2773 = vmatprep.subr.mxu0 %v2974_v4 }
 0x518   : > { %2766 = vmatmul.mubr.msk.f32.vlgmr.msra.gmra.mxu0 %vm464_vm1, %v1293_v25 }
 0x519   : > { %2774 = vmatpush3.xpose.msk.msra.mxu0 %vm464_vm1, %v1461_v26  ;;  %2775 = vmatprep.mubr.msk.f32.mxu0 %vm2975_vm0, %v2974_v4 }
 0x51a   : > { %2783 = vmatprep.subr.mxu0 %v2974_v4 }
 0x51c   : > { %2776 = vmatmul.mubr.msk.f32.vlgmr.msra.gmra.mxu0 %vm464_vm1, %v1459_v30 }
 0x51d   : > { %2784 = vmatpush3.xpose.msk.msra.mxu0 %vm464_vm1, %v1627_v32  ;;  %2785 = vmatprep.mubr.msk.f32.mxu0 %vm2975_vm0, %v2974_v4 }
 0x51e   : > { %2793 = vmatprep.subr.mxu0 %v2974_v4 }
 0x520   : > { %2786 = vmatmul.mubr.msk.f32.vlgmr.msra.gmra.mxu0 %vm464_vm1, %v1625_v33 }
 0x521   : > { %v2881_v34 = vpop.eup %2880  ;;  %2825 = vmatprep.mubr.msk.f32.mxu0 %vm2975_vm0, %v2974_v4 }
 0x522   : > { %2741 = vmatmul.mubr.msk.f32.vlgmr.msra.gmra.mxu1 %vm542_vm2, %v2881_v34  ;;  %v879_v59 = vsel %vm542_vm2, %v2881_v34, 0.0 }
 0x523   : > { %2744 = vmatpush3.xpose.msk.msra.mxu1 %vm464_vm1, %v963_v12  ;;  %2745 = vmatprep.mubr.msk.f32.mxu1 %vm2975_vm0, %v2974_v4 }
 0x524   : > { %2748 = vmatprep.subr.mxu1 %v2974_v4 }
 0x526   : > { %2746 = vmatmul.mubr.msk.f32.vlgmr.msra.gmra.mxu1 %vm464_vm1, %v961_v13 }
 0x527   : > { %2750 = vmatprep.mubr.msk.f32.mxu1 %vm2975_vm0, %v2974_v4 }
 0x5d4   : > { %v1200_v35 = vpop.f32.mrf.mxu0 }
 0x5d5   : > { %v1204_v36 = vmul.f32 0.25, %v1200_v35 }
 0x5d6   : > { %v2757_v37 = vpop.f32.mrf.mxu0 }
 0x5d7   : > { %v1205_v38 = vsel %vm542_vm2, %v1204_v36, -inf  ;;  %v1845_v37 = vld [vmem:[%s3915_s2 + $0x70] sm:$0xff] }
 0x5d8   : > { %1206 = vmax.xlane.f32.xlu1 %v1205_v38  ;;  %v1366_v39 = vpop.f32.mrf.mxu0  ;;  %v1844_v38 = vld [vmem:[%s3915_s2 + $0x68] sm:$0xff] }
 0x5d9   : > { %v1370_v40 = vmul.f32 0.25, %v1366_v39  ;;  %v1842_v39 = vld [vmem:[%s3915_s2 + $0x58] sm:$0xff] }
 0x5da   : > { %v2767_v41 = vpop.f32.mrf.mxu0 }
 0x5db   : > { %v1371_v42 = vsel %vm542_vm2, %v1370_v40, -inf  ;;  %v1840_v41 = vld [vmem:[%s3915_s2 + $0x48] sm:$0xff] }
 0x5dc   : > { %1372 = vmax.xlane.f32.xlu0 %v1371_v42  ;;  %v1532_v43 = vpop.f32.mrf.mxu0 }
 0x5dd   : > { %v1536_v45 = vmul.f32 0.25, %v1532_v43 }
 0x5de   : > { %v2777_v46 = vpop.f32.mrf.mxu0 }
 0x5df   : > { %v1537_v47 = vsel %vm542_vm2, %v1536_v45, -inf  ;;  %v1838_v46 = vld [vmem:[%s3915_s2 + $0x38] sm:$0xff] }
 0x5e0   : > { %1538 = vmax.xlane.f32.xlu0 %v1537_v47  ;;  %v1698_v48 = vpop.f32.mrf.mxu0 }
 0x5e1   : > { %v1702_v49 = vmul.f32 0.25, %v1698_v48  ;;  %v1837_v48 = vld [vmem:[%s3915_s2 + $0x30] sm:$0xff] }
 0x5e2   : > { %v3351_v50 = vpop.f32.mrf.mxu1  ;;  %v2787_v51 = vpop.f32.mrf.mxu0 }
 0x5e3   : > { %v1703_v53 = vsel %vm542_vm2, %v1702_v49, -inf  ;;  %v1835_v51 = vld [vmem:[%s3915_s2 + $0x20] sm:$0xff] }
 0x5e4   : > { %1704 = vmax.xlane.f32.xlu1 %v1703_v53  ;;  %v2742_v54 = vpop.f32.mrf.mxu1  ;;  %v1834_v53 = vld [vmem:[%s3915_s2 + $0x18] sm:$0xff] }
 0x5e6   : > { %v1034_v55 = vpop.f32.mrf.mxu1 }
 0x5e7   : > { %v1038_v56 = vmul.f32 0.25, %v1034_v55 }
 0x5e8   : > { %v2747_v57 = vpop.f32.mrf.mxu1 }
 0x5e9   : > { %v1039_v58 = vsel %vm542_vm2, %v1038_v56, -inf }
 0x5ea   : > { %1040 = vmax.xlane.f32.xlu0 %v1039_v58 }
 0x5f5   : > { %1214 = vrot.lane.b32.xlu1 %v3262_v52, %s2979_s20 }
 0x5f9   : > { %1380 = vrot.lane.b32.xlu1 %v3262_v52, %s2980_s21 }
 0x5fd   : > { %1712 = vrot.lane.b32.xlu1 %v3262_v52, %s2982_s22 }
 0x600   : > { %1048 = vrot.lane.b32.xlu0 %v3262_v52, %s2978_s14 }
 0x604   : > { %1546 = vrot.lane.b32.xlu0 %v3262_v52, %s2981_s15 }
 0x621   : > { %880 = vadd.xlane.f32.xlu1 %v879_v59  ;;  %v1833_v59 = vld [vmem:[%s3915_s2 + $0x10] sm:$0xff] }
 0x623   : > { %713 = vadd.xlane.f32.xlu0 %v712_v60  ;;  %v1832_v60 = vld [vmem:[%s3915_s2 + $0x8] sm:$0xff] }
 0x661   : > { %v1207_v61 = vpop.xlane.xlu1 %1206 }
 0x662   : > { %v1208_v63 = vsub.f32 %v1204_v36, %v1207_v61  ;;  %v1846_v36 = vld [vmem:[%s3915_s2 + $0x78] sm:$0xff] }
 0x663   : > { %2794 = vmatpush3.msra.mxu0 %v1846_v36  ;;  %v2014_v36 = vld [vmem:[%s3916_s3 + $0x1d8] sm:$0xff] }
 0x664   : > { %v1209_v0 = vmul.f32 1.442695, %v1208_v63  ;;  %2795 = vmatprep.subr.mxu0 %v2974_v4 }
 0x665   : > { %v1373_v2 = vpop.xlane.xlu0 %1372  ;;  %2796 = vmatpush3.msra.mxu0 %v1845_v37  ;;  %v2011_v37 = vld [vmem:[%s3916_s3 + $0x1c0] sm:$0xff] }
 0x666   : > { %2882 = vpow2.f32 %v1209_v0  ;;  %v1374_v3 = vsub.f32 %v1370_v40, %v1373_v2  ;;  %2797 = vmatprep.subr.mxu0 %v2974_v4  ;;  %v1841_v40 = vld [vmem:[%s3915_s2 + $0x50] sm:$0xff] }
 0x667   : > { %2798 = vmatpush3.msra.mxu0 %v1844_v38  ;;  %v2013_v38 = vld [vmem:[%s3916_s3 + $0x1d0] sm:$0xff] }
 0x668   : > { %v1375_v5 = vmul.f32 1.442695, %v1374_v3  ;;  %2799 = vmatprep.subr.mxu0 %v2974_v4  ;;  %v1831_v3 = vld [vmem:[%s3915_s2] sm:$0xff] }
 0x669   : > { %v1539_v8 = vpop.xlane.xlu0 %1538 }
 0x66a   : > { %2884 = vpow2.f32 %v1375_v5  ;;  %v1540_v52 = vsub.f32 %v1536_v45, %v1539_v8  ;;  %v1839_v45 = vld [vmem:[%s3915_s2 + $0x40] sm:$0xff] }
 0x66c   : > { %v1541_v14 = vmul.f32 1.442695, %v1540_v52 }
 0x66d   : > { %v1705_v6 = vpop.xlane.xlu1 %1704 }
 0x66e   : > { %v1706_v7 = vsub.f32 %v1702_v49, %v1705_v6  ;;  %v1836_v49 = vld [vmem:[%s3915_s2 + $0x28] sm:$0xff] }
 0x670   : > { %v1707_v9 = vmul.f32 1.442695, %v1706_v7 }
 0x671   : > { %v1215_v22 = vpop.permute.xlu1 %1214 }
 0x672   : > { %2886 = vpow2.f32 %v1707_v9 }
 0x673   : > { %v2883_v10 = vpop.eup %2882  ;;  %v1041_v11 = vpop.xlane.xlu0 %1040 }
 0x674   : > { %v1042_v12 = vsub.f32 %v1038_v56, %v1041_v11  ;;  %v1211_v13 = vsel %vm542_vm2, %v2883_v10, 0.0 }
 0x675   : > { %1212 = vadd.xlane.f32.xlu0 %v1211_v13  ;;  %v1381_v26 = vpop.permute.xlu1 %1380 }
 0x676   : > { %v1043_v15 = vmul.f32 1.442695, %v1042_v12 }
 0x677   : > { %v2885_v16 = vpop.eup %2884  ;;  %v1049_v17 = vpop.permute.xlu0 %1048 }
 0x678   : > { %2888 = vpow2.f32 %v1043_v15  ;;  %2749 = vmatpush3.msra.mxu1 %v1049_v17  ;;  %v1377_v19 = vsel %vm542_vm2, %v2885_v16, 0.0 }
 0x679   : > { %1378 = vadd.xlane.f32.xlu1 %v1377_v19  ;;  %2758 = vmatprep.subr.mxu1 %v2974_v4  ;;  %2890 = vpow2.f32 %v1541_v14  ;;  %v1713_v30 = vpop.permute.xlu1 %1712 }
 0x67b   : > { %v1547_v28 = vpop.permute.xlu0 %1546 }
 0x67f   : > { %v2887_v20 = vpop.eup %2886 }
 0x680   : > { %v1709_v21 = vsel %vm542_vm2, %v2887_v20, 0.0 }
 0x681   : > { %1710 = vadd.xlane.f32.xlu1 %v1709_v21 }
 0x685   : > { %v2889_v23 = vpop.eup %2888 }
 0x686   : > { %2751 = vmatmul.mubr.msk.f32.vlgmr.msra.gmra.mxu1 %vm542_vm2, %v2889_v23  ;;  %v1045_v24 = vsel %vm542_vm2, %v2889_v23, 0.0  ;;  %v2891_v25 = vpop.eup %2890 }
 0x687   : > { %2759 = vmatpush3.msra.mxu1 %v1215_v22  ;;  %1046 = vadd.xlane.f32.xlu0 %v1045_v24  ;;  %v1543_v27 = vsel %vm542_vm2, %v2891_v25, 0.0 }
 0x688   : > { %2760 = vmatprep.mubr.msk.f32.mxu1 %vm2975_vm0, %v2974_v4  ;;  %2768 = vmatprep.subr.mxu1 %v2974_v4 }
 0x68a   : > { %2761 = vmatmul.mubr.msk.f32.vlgmr.msra.gmra.mxu1 %vm542_vm2, %v2883_v10 }
 0x68b   : > { %2769 = vmatpush3.msra.mxu1 %v1381_v26  ;;  %1544 = vadd.xlane.f32.xlu0 %v1543_v27 }
 0x68c   : > { %2770 = vmatprep.mubr.msk.f32.mxu1 %vm2975_vm0, %v2974_v4  ;;  %2778 = vmatprep.subr.mxu1 %v2974_v4 }
 0x68e   : > { %2771 = vmatmul.mubr.msk.f32.vlgmr.msra.gmra.mxu1 %vm542_vm2, %v2885_v16 }
 0x68f   : > { %2779 = vmatpush3.msra.mxu1 %v1547_v28  ;;  %550 = vadd.xlane.f32.xlu0 %v549_v29 }
 0x690   : > { %2780 = vmatprep.mubr.msk.f32.mxu1 %vm2975_vm0, %v2974_v4  ;;  %2788 = vmatprep.subr.mxu1 %v2974_v4 }
 0x692   : > { %2781 = vmatmul.mubr.msk.f32.vlgmr.msra.gmra.mxu1 %vm542_vm2, %v2891_v25 }
 0x693   : > { %2789 = vmatpush3.msra.mxu1 %v1713_v30  ;;  %2790 = vmatprep.mubr.msk.f32.mxu1 %vm2975_vm0, %v2974_v4 }
 0x696   : > { %2791 = vmatmul.mubr.msk.f32.vlgmr.msra.gmra.mxu1 %vm542_vm2, %v2887_v20 }
 0x697   : > { %2105 = vmatprep.mubr.f32.mxu1 %v2974_v4 }
 0x6aa   : > { %v881_v31 = vpop.xlane.xlu1 %880 }
 0x6ab   : > { %2892 = vrcp.f32 %v881_v31 }
 0x6ac   : > { %v714_v62 = vpop.xlane.xlu0 %713 }
 0x6ad   : > { %2894 = vrcp.f32 %v714_v62 }
 0x6b8   : > { %v2893_v32 = vpop.eup %2892 }
 0x6b9   : > { %v959_v33 = vmul.f32 %v2893_v32, %v3351_v50 }
 0x6ba   : > { %v2895_v34 = vpop.eup %2894 }
 0x6bb   : > { %1795 = vrot.lane.b32.xlu0 %v959_v33, %s2981_s15  ;;  %v793_v35 = vmul.f32 %v2895_v34, %v3317_v18  ;;  %v1843_v18 = vld [vmem:[%s3915_s2 + $0x60] sm:$0xff]  ;;  %v2018_v33 = vld [vmem:[%s3916_s3 + $0x1f8] sm:$0xff] }
 0x6bc   : > { %2800 = vmatpush3.msra.mxu0 %v1843_v18  ;;  %v2015_v34 = vld [vmem:[%s3916_s3 + $0x1e0] sm:$0xff]  ;;  %v2008_v18 = vld [vmem:[%s3916_s3 + $0x1a8] sm:$0xff] }
 0x6bd   : > { %1791 = vrot.lane.b32.xlu1 %v793_v35, %s2982_s22  ;;  %2801 = vmatprep.subr.mxu0 %v2974_v4  ;;  %v2017_v35 = vld [vmem:[%s3916_s3 + $0x1f0] sm:$0xff] }
 0x6be   : > { %2802 = vmatpush3.msra.mxu0 %v1842_v39  ;;  %v2010_v39 = vld [vmem:[%s3916_s3 + $0x1b8] sm:$0xff] }
 0x6bf   : > { %2803 = vmatprep.subr.mxu0 %v2974_v4 }
 0x6c0   : > { %2804 = vmatpush3.msra.mxu0 %v1841_v40  ;;  %v2007_v40 = vld [vmem:[%s3916_s3 + $0x1a0] sm:$0xff] }
 0x6c1   : > { %2805 = vmatprep.subr.mxu0 %v2974_v4 }
 0x6c2   : > { %2806 = vmatpush3.msra.mxu0 %v1840_v41  ;;  %v2009_v41 = vld [vmem:[%s3916_s3 + $0x1b0] sm:$0xff] }
 0x6c3   : > { %2807 = vmatprep.subr.mxu0 %v2974_v4 }
 0x6c4   : > { %2808 = vmatpush3.msra.mxu0 %v1839_v45  ;;  %v2003_v45 = vld [vmem:[%s3916_s3 + $0x180] sm:$0xff] }
 0x6c5   : > { %2809 = vmatprep.subr.mxu0 %v2974_v4 }
 0x6c6   : > { %2810 = vmatpush3.msra.mxu0 %v1838_v46  ;;  %v2005_v46 = vld [vmem:[%s3916_s3 + $0x190] sm:$0xff] }
 0x6c7   : > { %2811 = vmatprep.subr.mxu0 %v2974_v4 }
 0x6c8   : > { %2812 = vmatpush3.msra.mxu0 %v1837_v48  ;;  %v2002_v48 = vld [vmem:[%s3916_s3 + $0x178] sm:$0xff] }
 0x6c9   : > { %2813 = vmatprep.subr.mxu0 %v2974_v4 }
 0x6ca   : > { %2814 = vmatpush3.msra.mxu0 %v1836_v49  ;;  %v1999_v49 = vld [vmem:[%s3916_s3 + $0x160] sm:$0xff] }
 0x6cb   : > { %2815 = vmatprep.subr.mxu0 %v2974_v4 }
 0x6cc   : > { %2816 = vmatpush3.msra.mxu0 %v1835_v51  ;;  %v1996_v51 = vld [vmem:[%s3916_s3 + $0x148] sm:$0xff] }
 0x6cd   : > { %2817 = vmatprep.subr.mxu0 %v2974_v4 }
 0x6ce   : > { %2818 = vmatpush3.msra.mxu0 %v1834_v53  ;;  %v1998_v53 = vld [vmem:[%s3916_s3 + $0x158] sm:$0xff] }
 0x6cf   : > { %2819 = vmatprep.subr.mxu0 %v2974_v4 }
 0x6d0   : > { %2820 = vmatpush3.msra.mxu0 %v1833_v59  ;;  %v1993_v59 = vld [vmem:[%s3916_s3 + $0x130] sm:$0xff] }
 0x6d1   : > { %2821 = vmatprep.subr.mxu0 %v2974_v4 }
 0x6d2   : > { %2822 = vmatpush3.msra.mxu0 %v1832_v60  ;;  %v1988_v60 = vld [vmem:[%s3916_s3 + $0x108] sm:$0xff] }
 0x6d3   : > { %2823 = vmatprep.subr.mxu0 %v2974_v4 }
 0x6d4   : > { %2824 = vmatpush3.msra.mxu0 %v1831_v3  ;;  %v1986_v3 = vld [vmem:[%s3916_s3 + $0xf8] sm:$0xff] }
 0x6d5   : > { %2112 = vmatprep.subr.mxu0 %v2018_v33  ;;  %v2218_v33 = vld [vmem:[%s3917_s4 + $0xf8] sm:$0xff] }
 0x6fe   : > { %v1213_v42 = vpop.xlane.xlu0 %1212 }
 0x702   : > { %v1379_v47 = vpop.xlane.xlu1 %1378 }
 0x70a   : > { %v1711_v55 = vpop.xlane.xlu1 %1710 }
 0x710   : > { %v1047_v43 = vpop.xlane.xlu0 %1046 }
 0x711   : > { %2896 = vrcp.f32 %v1047_v43  ;;  %v2006_v43 = vld [vmem:[%s3916_s3 + $0x198] sm:$0xff] }
 0x712   : > { %2898 = vrcp.f32 %v1213_v42  ;;  %v2004_v42 = vld [vmem:[%s3916_s3 + $0x188] sm:$0xff] }
 0x713   : > { %2900 = vrcp.f32 %v1379_v47  ;;  %v2000_v47 = vld [vmem:[%s3916_s3 + $0x168] sm:$0xff] }
 0x714   : > { %v1545_v50 = vpop.xlane.xlu0 %1544 }
 0x715   : > { %2902 = vrcp.f32 %v1545_v50  ;;  %v2001_v50 = vld [vmem:[%s3916_s3 + $0x170] sm:$0xff] }
 0x716   : > { %2904 = vrcp.f32 %v1711_v55  ;;  %v1997_v55 = vld [vmem:[%s3916_s3 + $0x150] sm:$0xff] }
 0x718   : > { %v551_v16 = vpop.xlane.xlu0 %550 }
 0x719   : > { %2906 = vrcp.f32 %v551_v16  ;;  %v1971_v16 = vld [vmem:[%s3916_s3 + $0x80] sm:$0xff] }
 0x71e   : > { %v2897_v54 = vpop.eup %2896 }
 0x71f   : > { %v2899_v61 = vpop.eup %2898 }
 0x720   : > { %v2901_v5 = vpop.eup %2900 }
 0x722   : > { %v2903_v9 = vpop.eup %2902 }
 0x723   : > { %v2905_v12 = vpop.eup %2904 }
 0x726   : > { %v2907_v20 = vpop.eup %2906 }
 0x727   : > { %v626_v21 = vmul.f32 %v2907_v20, %v3285_v1  ;;  %v2016_v1 = vld [vmem:[%s3916_s3 + $0x1e8] sm:$0xff]  ;;  %v1970_v20 = vld [vmem:[%s3916_s3 + $0x78] sm:$0xff] }
 0x728   : > { %2041 = vmatprep.subr.mxu1 %v2016_v1  ;;  %v1957_v1 = vld [vmem:[%s3916_s3 + $0x10] sm:$0xff] }
 0x729   : > { %2042 = vmatpush1.msra.mxu1 %v2015_v34  ;;  %v2250_v34 = vld [vmem:[%s3917_s4 + $0x1f8] sm:$0xff] }
 0x72d   : > { %v1796_v22 = vpop.permute.xlu0 %1795 }
 0x72f   : > { %v1792_v17 = vpop.permute.xlu1 %1791 }
 0x730   : > { %v1818_v23 = vsel %vm464_vm1, %v626_v21, %v1792_v17  ;;  %v1973_v17 = vld [vmem:[%s3916_s3 + $0x90] sm:$0xff]  ;;  %v1967_v21 = vld [vmem:[%s3916_s3 + $0x60] sm:$0xff] }
 0x731   : > { %v1820_v25 = vsel %vm1819_vm3, %v1818_v23, %v1796_v22  ;;  %v1969_v22 = vld [vmem:[%s3916_s3 + $0x70] sm:$0xff]  ;;  %v1964_v23 = vld [vmem:[%s3916_s3 + $0x48] sm:$0xff] }
 0x746   : > { %v1120_v56 = vpop.f32.mrf.mxu1 }
 0x747   : > { %v1125_v57 = vmul.f32 %v2897_v54, %v1120_v56  ;;  %v1995_v54 = vld [vmem:[%s3916_s3 + $0x140] sm:$0xff]  ;;  %v1992_v56 = vld [vmem:[%s3916_s3 + $0x128] sm:$0xff] }
 0x748   : > { %v2752_v58 = vpop.f32.mrf.mxu1 }
 0x749   : > { %1799 = vrot.lane.b32.xlu1 %v1125_v57, %s2980_s21  ;;  %v1994_v57 = vld [vmem:[%s3916_s3 + $0x138] sm:$0xff]  ;;  %v1991_v58 = vld [vmem:[%s3916_s3 + $0x120] sm:$0xff] }
 0x74a   : > { %v1286_v63 = vpop.f32.mrf.mxu1 }
 0x74b   : > { %v1291_v0 = vmul.f32 %v2899_v61, %v1286_v63  ;;  %v1990_v61 = vld [vmem:[%s3916_s3 + $0x118] sm:$0xff]  ;;  %v1987_v63 = vld [vmem:[%s3916_s3 + $0x100] sm:$0xff] }
 0x74c   : > { %v2762_v2 = vpop.f32.mrf.mxu1 }
 0x74d   : > { %1803 = vrot.lane.b32.xlu1 %v1291_v0, %s2979_s20  ;;  %v1989_v0 = vld [vmem:[%s3916_s3 + $0x110] sm:$0xff]  ;;  %v1984_v2 = vld [vmem:[%s3916_s3 + $0xe8] sm:$0xff] }
 0x74e   : > { %v1452_v6 = vpop.f32.mrf.mxu1 }
 0x74f   : > { %v1457_v7 = vmul.f32 %v2901_v5, %v1452_v6  ;;  %v1983_v5 = vld [vmem:[%s3916_s3 + $0xe0] sm:$0xff]  ;;  %v1985_v6 = vld [vmem:[%s3916_s3 + $0xf0] sm:$0xff] }
 0x750   : > { %v2772_v8 = vpop.f32.mrf.mxu1 }
 0x751   : > { %1807 = vrot.lane.b32.xlu0 %v1457_v7, %s2978_s14  ;;  %v1980_v7 = vld [vmem:[%s3916_s3 + $0xc8] sm:$0xff]  ;;  %v1982_v8 = vld [vmem:[%s3916_s3 + $0xd8] sm:$0xff]  ;;  %s2983_s14 = smov [#allocation2]  }
 0x752   : > { %v1618_v52 = vpop.f32.mrf.mxu1  ;;  %s2916_s20 = sshll.u32 %s2983_s14, 4  ;;  %s2917_s20 = int_to_ptr.vmem [resolvable:$false] %s2916_s20 }
 0x753   : > { %v1623_v10 = vmul.f32 %v2903_v9, %v1618_v52  ;;  %v1979_v9 = vld [vmem:[%s3916_s3 + $0xc0] sm:$0xff]  ;;  %v1981_v52 = vld [vmem:[%s3916_s3 + $0xd0] sm:$0xff]  ;;  %s2918_s28 = scalar_lea.vmem %s2917_s20, 256 }
 0x754   : > { %v2782_v11 = vpop.f32.mrf.mxu1 }
 0x755   : > { %1811 = vrot.lane.b32.xlu1 %v1623_v10, %s2977_s19  ;;  %v1976_v10 = vld [vmem:[%s3916_s3 + $0xa8] sm:$0xff]  ;;  %v1978_v11 = vld [vmem:[%s3916_s3 + $0xb8] sm:$0xff] }
 0x756   : > { %v1784_v13 = vpop.f32.mrf.mxu1 }
 0x757   : > { %v1789_v14 = vmul.f32 %v2905_v12, %v1784_v13  ;;  %v1975_v12 = vld [vmem:[%s3916_s3 + $0xa0] sm:$0xff]  ;;  %v1977_v13 = vld [vmem:[%s3916_s3 + $0xb0] sm:$0xff] }
 0x758   : > { %v2792_v15 = vpop.f32.mrf.mxu1 }
 0x759   : > { %1815 = vrot.lane.b32.xlu0 %v1789_v14, %s2976_s18  ;;  %v1972_v14 = vld [vmem:[%s3916_s3 + $0x88] sm:$0xff]  ;;  %v1974_v15 = vld [vmem:[%s3916_s3 + $0x98] sm:$0xff]  ;;  %s267_s18 = sand.u32 1, %s2964_s25  }
 0x75a   : > { %s2506_s19 = sshll.u32 %s267_s18, 3  ;;  %s2430_s9 = scalar_lea.sflag [#allocation3], %s267_s18 }
 0x75b   : > { %s269_s15 = scalar_lea.vmem [#allocation2], %s2506_s19 }
 0x75c   : > { %s2443_s22 = sshll.u32 %s269_s15, 4  ;;  %s2444_s22 = int_to_ptr.vmem [resolvable:$true] %s2443_s22 }
 0x75d   : > { %s2912_s13 = scalar_lea.vmem %s2444_s22, 128  ;;  %p2919_p0 = scmp.lt.s32.totalorder %s2444_s22, %s2917_s20 }
 0x75e   : > { %p2913_p11 = scmp.ne.s32.totalorder %s2444_s22, %s2912_s13  ;;  %p2920_p1 = scmp.lt.s32.totalorder %s2918_s28, %s2912_s13 }
 0x760   : > { %p2914_p12 = pnand %p2913_p11, %p3062_p5  ;;  %p2921_p2 = por %p2920_p1, %p2919_p0 }
 0x762   : > { %p2915_p13 = pneg %p2914_p12 }
 0x764   : > { %p2922_p3 = pnand %p2921_p2, %p2915_p13 }
 0x7bb   : > { %v1800_v19 = vpop.permute.xlu1 %1799 }
 0x7bc   : > { %v1822_v27 = vsel %vm1821_vm4, %v1820_v25, %v1800_v19  ;;  %v1968_v19 = vld [vmem:[%s3916_s3 + $0x68] sm:$0xff]  ;;  %v1963_v25 = vld [vmem:[%s3916_s3 + $0x40] sm:$0xff] }
 0x7bf   : > { %v1804_v24 = vpop.permute.xlu1 %1803 }
 0x7c0   : > { %v1824_v29 = vsel %vm1823_vm5, %v1822_v27, %v1804_v24  ;;  %v1966_v24 = vld [vmem:[%s3916_s3 + $0x58] sm:$0xff]  ;;  %v1960_v27 = vld [vmem:[%s3916_s3 + $0x28] sm:$0xff] }
 0x7c3   : > { %v1808_v26 = vpop.permute.xlu0 %1807 }
 0x7c4   : > { %v1826_v30 = vsel %vm1825_vm6, %v1824_v29, %v1808_v26  ;;  %v1965_v26 = vld [vmem:[%s3916_s3 + $0x50] sm:$0xff]  ;;  %v1959_v29 = vld [vmem:[%s3916_s3 + $0x20] sm:$0xff] }
 0x7c7   : > { %v1812_v28 = vpop.permute.xlu1 %1811 }
 0x7c8   : > { %v1828_v31 = vsel %vm1827_vm7, %v1826_v30, %v1812_v28  ;;  %v1962_v28 = vld [vmem:[%s3916_s3 + $0x38] sm:$0xff]  ;;  %v1961_v30 = vld [vmem:[%s3916_s3 + $0x30] sm:$0xff] }
 0x7cb   : > { %v1816_v62 = vpop.permute.xlu0 %1815 }
 0x7cc   : > { %v1830_v32 = vsel %vm1829_vm8, %v1828_v31, %v1816_v62  ;;  %v1956_v31 = vld [vmem:[%s3916_s3 + $0x8] sm:$0xff]  ;;  %v1958_v62 = vld [vmem:[%s3916_s3 + $0x18] sm:$0xff] }
 0x7cd   : > { %2826 = vmatmul.mubr.f32.vlgmr.msra.gmra.mxu0 %v1830_v32  ;;  %v1955_v32 = vld [vmem:[%s3916_s3] sm:$0xff] }
 0x7ce   : > { %2176 = vmatprep.mubr.f32.mxu0 %v2974_v4  ;;  %2113 = vmatpush1.msra.mxu0 %v2017_v35  ;;  %v2012_v4 = vld [vmem:[%s3916_s3 + $0x1c8] sm:$0xff]  ;;  %v2532_v35 = vld [vmem:[%s3919_s6] ss:$0 sm:$0xff] }
 0x7cf   : > { %2043 = vmatprep.subr.mxu1 %v2012_v4  ;;  %2114 = vmatprep.subr.mxu0 %v2014_v36 }
 0x7d0   : > { %2044 = vmatpush1.msra.mxu1 %v2011_v37  ;;  %2115 = vmatpush1.msra.mxu0 %v2013_v38 }
 0x7d1   : > { %2045 = vmatprep.subr.mxu1 %v2008_v18  ;;  %2116 = vmatprep.subr.mxu0 %v2010_v39 }
 0x7d2   : > { %2046 = vmatpush1.msra.mxu1 %v2007_v40  ;;  %2117 = vmatpush1.msra.mxu0 %v2009_v41 }
 0x7d3   : > { %2047 = vmatprep.subr.mxu1 %v2004_v42  ;;  %2118 = vmatprep.subr.mxu0 %v2006_v43 }
 0x7d4   : > { %2048 = vmatpush1.msra.mxu1 %v2003_v45  ;;  %2119 = vmatpush1.msra.mxu0 %v2005_v46 }
 0x7d5   : > { %2049 = vmatprep.subr.mxu1 %v2000_v47  ;;  %2120 = vmatprep.subr.mxu0 %v2002_v48 }
 0x7d6   : > { %2050 = vmatpush1.msra.mxu1 %v1999_v49  ;;  %2121 = vmatpush1.msra.mxu0 %v2001_v50 }
 0x7d7   : > { %2051 = vmatprep.subr.mxu1 %v1996_v51  ;;  %2122 = vmatprep.subr.mxu0 %v1998_v53 }
 0x7d8   : > { %2052 = vmatpush1.msra.mxu1 %v1995_v54  ;;  %2123 = vmatpush1.msra.mxu0 %v1997_v55 }
 0x7d9   : > { %2053 = vmatprep.subr.mxu1 %v1992_v56  ;;  %2124 = vmatprep.subr.mxu0 %v1994_v57 }
 0x7da   : > { %2054 = vmatpush1.msra.mxu1 %v1991_v58  ;;  %2125 = vmatpush1.msra.mxu0 %v1993_v59  ;;  %v2534_v59 = vld [vmem:[%s3919_s6 + $0x2] ss:$0 sm:$0xff] }
 0x7db   : > { %2055 = vmatprep.subr.mxu1 %v1988_v60  ;;  %2126 = vmatprep.subr.mxu0 %v1990_v61 }
 0x7dc   : > { %2056 = vmatpush1.msra.mxu1 %v1987_v63  ;;  %2127 = vmatpush1.msra.mxu0 %v1989_v0  ;;  %v2202_v63 = vld [vmem:[%s3917_s4 + $0x78] sm:$0xff] }
 0x7dd   : > { %2057 = vmatprep.subr.mxu1 %v1984_v2  ;;  %2128 = vmatprep.subr.mxu0 %v1986_v3  ;;  %v2234_v0 = vld [vmem:[%s3917_s4 + $0x178] sm:$0xff]  ;;  %v2217_v2 = vld [vmem:[%s3917_s4 + $0xf0] sm:$0xff] }
 0x7de   : > { %2058 = vmatpush1.msra.mxu1 %v1983_v5  ;;  %2129 = vmatpush1.msra.mxu0 %v1985_v6  ;;  %v2249_v3 = vld [vmem:[%s3917_s4 + $0x1f0] sm:$0xff] }
 0x7df   : > { %2059 = vmatprep.subr.mxu1 %v1980_v7  ;;  %2130 = vmatprep.subr.mxu0 %v1982_v8  ;;  %v2201_v5 = vld [vmem:[%s3917_s4 + $0x70] sm:$0xff]  ;;  %v2216_v7 = vld [vmem:[%s3917_s4 + $0xe8] sm:$0xff] }
 0x7e0   : > { %2060 = vmatpush1.msra.mxu1 %v1979_v9  ;;  %2131 = vmatpush1.msra.mxu0 %v1981_v52  ;;  %v2233_v6 = vld [vmem:[%s3917_s4 + $0x170] sm:$0xff]  ;;  %v2248_v8 = vld [vmem:[%s3917_s4 + $0x1e8] sm:$0xff] }
 0x7e1   : > { %2061 = vmatprep.subr.mxu1 %v1976_v10  ;;  %2132 = vmatprep.subr.mxu0 %v1978_v11  ;;  %v2200_v9 = vld [vmem:[%s3917_s4 + $0x68] sm:$0xff]  ;;  %v2215_v10 = vld [vmem:[%s3917_s4 + $0xe0] sm:$0xff] }
 0x7e2   : > { %2062 = vmatpush1.msra.mxu1 %v1975_v12  ;;  %2133 = vmatpush1.msra.mxu0 %v1977_v13  ;;  %v2232_v52 = vld [vmem:[%s3917_s4 + $0x168] sm:$0xff]  ;;  %v2247_v11 = vld [vmem:[%s3917_s4 + $0x1e0] sm:$0xff] }
 0x7e3   : > { %2063 = vmatprep.subr.mxu1 %v1972_v14  ;;  %2134 = vmatprep.subr.mxu0 %v1974_v15  ;;  %v2199_v12 = vld [vmem:[%s3917_s4 + $0x60] sm:$0xff]  ;;  %v2214_v14 = vld [vmem:[%s3917_s4 + $0xd8] sm:$0xff] }
 0x7e4   : > { %2064 = vmatpush1.msra.mxu1 %v1971_v16  ;;  %2135 = vmatpush1.msra.mxu0 %v1973_v17  ;;  %v2231_v13 = vld [vmem:[%s3917_s4 + $0x160] sm:$0xff]  ;;  %v2246_v15 = vld [vmem:[%s3917_s4 + $0x1d8] sm:$0xff] }
 0x7e5   : > { %2065 = vmatprep.subr.mxu1 %v1968_v19  ;;  %2136 = vmatprep.subr.mxu0 %v1970_v20  ;;  %v2198_v16 = vld [vmem:[%s3917_s4 + $0x58] sm:$0xff]  ;;  %v2213_v19 = vld [vmem:[%s3917_s4 + $0xd0] sm:$0xff] }
 0x7e6   : > { %2066 = vmatpush1.msra.mxu1 %v1967_v21  ;;  %2137 = vmatpush1.msra.mxu0 %v1969_v22  ;;  %v2230_v17 = vld [vmem:[%s3917_s4 + $0x158] sm:$0xff]  ;;  %v2245_v20 = vld [vmem:[%s3917_s4 + $0x1d0] sm:$0xff] }
 0x7e7   : > { %2067 = vmatprep.subr.mxu1 %v1964_v23  ;;  %2138 = vmatprep.subr.mxu0 %v1966_v24  ;;  %v2197_v21 = vld [vmem:[%s3917_s4 + $0x50] sm:$0xff]  ;;  %v2212_v23 = vld [vmem:[%s3917_s4 + $0xc8] sm:$0xff] }
 0x7e8   : > { %2068 = vmatpush1.msra.mxu1 %v1963_v25  ;;  %2139 = vmatpush1.msra.mxu0 %v1965_v26  ;;  %v2229_v22 = vld [vmem:[%s3917_s4 + $0x150] sm:$0xff]  ;;  %v2244_v24 = vld [vmem:[%s3917_s4 + $0x1c8] sm:$0xff] }
 0x7e9   : > { %2069 = vmatprep.subr.mxu1 %v1960_v27  ;;  %2140 = vmatprep.subr.mxu0 %v1962_v28  ;;  %v2196_v25 = vld [vmem:[%s3917_s4 + $0x48] sm:$0xff]  ;;  %v2211_v27 = vld [vmem:[%s3917_s4 + $0xc0] sm:$0xff] }
 0x7ea   : > { %2070 = vmatpush1.msra.mxu1 %v1959_v29  ;;  %2141 = vmatpush1.msra.mxu0 %v1961_v30  ;;  %v2228_v26 = vld [vmem:[%s3917_s4 + $0x148] sm:$0xff]  ;;  %v2243_v28 = vld [vmem:[%s3917_s4 + $0x1c0] sm:$0xff] }
 0x7eb   : > { %2071 = vmatprep.subr.mxu1 %v1956_v31  ;;  %2142 = vmatprep.subr.mxu0 %v1958_v62  ;;  %v2195_v29 = vld [vmem:[%s3917_s4 + $0x40] sm:$0xff]  ;;  %v2210_v31 = vld [vmem:[%s3917_s4 + $0xb8] sm:$0xff] }
 0x7ec   : > { %2072 = vmatpush1.msra.mxu1 %v1955_v32  ;;  %2143 = vmatpush1.msra.mxu0 %v1957_v1  ;;  %v2227_v30 = vld [vmem:[%s3917_s4 + $0x140] sm:$0xff]  ;;  %v2242_v62 = vld [vmem:[%s3917_s4 + $0x1b8] sm:$0xff] }
 0x7ed   : > { %2608 = vmatprep.subr.mxu1 %v2218_v33  ;;  %2643 = vmatprep.subr.mxu0 %v2250_v34  ;;  %v2194_v32 = vld [vmem:[%s3917_s4 + $0x38] sm:$0xff]  ;;  %v2209_v33 = vld [vmem:[%s3917_s4 + $0xb0] sm:$0xff] }
 0x7ee   : > { %v2226_v1 = vld [vmem:[%s3917_s4 + $0x138] sm:$0xff]  ;;  %v2241_v34 = vld [vmem:[%s3917_s4 + $0x1b0] sm:$0xff] }
 0x88d   : > { %v1918_v4 = vpop.f32.mrf.mxu0 }
 0x88e   : > { %v1919_v36 = vadd.f32 %v2532_v35, %v1918_v4  ;;  %v2193_v35 = vld [vmem:[%s3917_s4 + $0x30] sm:$0xff] }
 0x88f   : > { %v2827_v37 = vpop.f32.mrf.mxu0  ;;  %v2225_v4 = vld [vmem:[%s3917_s4 + $0x130] sm:$0xff] }
 0x890   : > { %v1922_v38 = vadd.f32 %v1919_v36, %v3219_v44  ;;  %v2533_v44 = vld [vmem:[%s3919_s6 + $0x1] ss:$0 sm:$0xff]  ;;  %v2208_v36 = vld [vmem:[%s3917_s4 + $0xa8] sm:$0xff] }
 0x891   : > { %v2240_v37 = vld [vmem:[%s3917_s4 + $0x1a8] sm:$0xff] }
 0x892   : > { %v1923_v18 = vrot.slane %v1922_v38, 4 }
 0x894   : > { %v1924_v39 = vadd.f32 %v1923_v18, %v1922_v38  ;;  %v2224_v18 = vld [vmem:[%s3917_s4 + $0x128] sm:$0xff] }
 0x896   : > { %v1925_v40 = vrot.slane %v1924_v39, 2 }
 0x898   : > { %v1926_v41 = vadd.f32 %v1925_v40, %v1924_v39  ;;  %v2207_v39 = vld [vmem:[%s3917_s4 + $0xa0] sm:$0xff] }
 0x899   : > { %v2239_v40 = vld [vmem:[%s3917_s4 + $0x1a0] sm:$0xff] }
 0x89a   : > { %v1927_v42 = vrot.slane %v1926_v41, 1 }
 0x89c   : > { %v1928_v43 = vadd.f32 %v1927_v42, %v1926_v41  ;;  %v2191_v41 = vld [vmem:[%s3917_s4 + $0x20] sm:$0xff] }
 0x89d   : > { %v2223_v42 = vld [vmem:[%s3917_s4 + $0x120] sm:$0xff] }
 0x89e   : > { %v1930_v45 = vmul.f32 0.125, %v1928_v43  ;;  %v2206_v43 = vld [vmem:[%s3917_s4 + $0x98] sm:$0xff] }
 0x8a0   : > { %v1931_v46 = vsub.f32 %v1922_v38, %v1930_v45  ;;  %v2192_v38 = vld [vmem:[%s3917_s4 + $0x28] sm:$0xff]  ;;  %v2238_v45 = vld [vmem:[%s3917_s4 + $0x198] sm:$0xff] }
 0x8a2   : > { %v1932_v47 = vmul.f32 %v1931_v46, %v1931_v46 }
 0x8a4   : > { %v1933_v48 = vrot.slane %v1932_v47, 4 }
 0x8a6   : > { %v1934_v49 = vadd.f32 %v1933_v48, %v1932_v47  ;;  %v2222_v47 = vld [vmem:[%s3917_s4 + $0x118] sm:$0xff]  ;;  %v2205_v48 = vld [vmem:[%s3917_s4 + $0x90] sm:$0xff] }
 0x8a8   : > { %v1935_v50 = vrot.slane %v1934_v49, 2 }
 0x8aa   : > { %v1936_v51 = vadd.f32 %v1935_v50, %v1934_v49  ;;  %v2237_v49 = vld [vmem:[%s3917_s4 + $0x190] sm:$0xff] }
 0x8ab   : > { %v2189_v50 = vld [vmem:[%s3917_s4 + $0x10] sm:$0xff] }
 0x8ac   : > { %v1937_v53 = vrot.slane %v1936_v51, 1 }
 0x8ae   : > { %v1938_v54 = vadd.f32 %v1937_v53, %v1936_v51  ;;  %v2221_v51 = vld [vmem:[%s3917_s4 + $0x110] sm:$0xff]  ;;  %v2204_v53 = vld [vmem:[%s3917_s4 + $0x88] sm:$0xff] }
 0x8b0   : > { %v1939_v55 = vmul.f32 0.125, %v1938_v54  ;;  %v2236_v54 = vld [vmem:[%s3917_s4 + $0x188] sm:$0xff] }
 0x8b2   : > { %v1940_v56 = vadd.f32 1e-05, %v1939_v55  ;;  %v2188_v55 = vld [vmem:[%s3917_s4 + $0x8] sm:$0xff] }
 0x8b4   : > { %2908 = vrsqrt.f32 %v1940_v56  ;;  %v2220_v56 = vld [vmem:[%s3917_s4 + $0x108] sm:$0xff] }
 0x8c1   : > { %v2909_v57 = vpop.eup %2908 }
 0x8c2   : > { %v1942_v58 = vmul.f32 %v2909_v57, %v1931_v46  ;;  %v2190_v46 = vld [vmem:[%s3917_s4 + $0x18] sm:$0xff]  ;;  %v2203_v57 = vld [vmem:[%s3917_s4 + $0x80] sm:$0xff] }
 0x8c4   : > { %v1948_v60 = vmul.f32 %v2533_v44, %v1942_v58  ;;  %v2235_v44 = vld [vmem:[%s3917_s4 + $0x180] sm:$0xff] }
 0x8c5   : > { %v2187_v58 = vld [vmem:[%s3917_s4] sm:$0xff] }
 0x8c6   : > { %v3676_v61 = vadd.f32 %v2534_v59, %v1948_v60  ;;  %v2219_v59 = vld [vmem:[%s3917_s4 + $0x100] sm:$0xff]  ;;  %v2021_v60 = vlaneseq }
 0x8c8   : > { %2106 = vmatmul.mubr.f32.vlgmr.msra.gmra.mxu1 %v3676_v61  ;;  %2177 = vmatmul.mubr.f32.vlgmr.msra.gmra.mxu0 %v3676_v61 }
 0x8c9   : > { %2609 = vmatpush3.msra.mxu1 %v2202_v63  ;;  %2644 = vmatpush3.msra.mxu0 %v2234_v0  ;;  %v2022_v63 = vshrl.u32 %v2021_v60, 7 }
 0x8ca   : > { %2610 = vmatprep.subr.mxu1 %v2217_v2  ;;  %2645 = vmatprep.subr.mxu0 %v2249_v3  ;;  %v2019_v3 = vld [vmem:[%s3918_s5] sm:$0xf] }
 0x8cb   : > { %2611 = vmatpush3.msra.mxu1 %v2201_v5  ;;  %2646 = vmatpush3.msra.mxu0 %v2233_v6  ;;  %v2023_v0 = vsub.s32 0, %v2022_v63  ;;  %v2031_v2 = vsub.s32 2, %v2022_v63  ;;  %v2027_v5 = vsub.s32 1, %v2022_v63  ;;  %v2035_v6 = vsub.s32 3, %v2022_v63 }
 0x8cc   : > { %2612 = vmatprep.subr.mxu1 %v2216_v7  ;;  %2647 = vmatprep.subr.mxu0 %v2248_v8 }
 0x8cd   : > { %2613 = vmatpush3.msra.mxu1 %v2200_v9  ;;  %2648 = vmatpush3.msra.mxu0 %v2232_v52  ;;  %v2024_v7 = vrot.slane %v2019_v3, %v2023_v0  ;;  %v2032_v8 = vrot.slane %v2019_v3, %v2031_v2  ;;  %v2028_v9 = vrot.slane %v2019_v3, %v2027_v5 }
 0x8ce   : > { %2614 = vmatprep.subr.mxu1 %v2215_v10  ;;  %2649 = vmatprep.subr.mxu0 %v2247_v11  ;;  %v2036_v52 = vrot.slane %v2019_v3, %v2035_v6 }
 0x8cf   : > { %2615 = vmatpush3.msra.mxu1 %v2199_v12  ;;  %2650 = vmatpush3.msra.mxu0 %v2231_v13 }
 0x8d0   : > { %2616 = vmatprep.subr.mxu1 %v2214_v14  ;;  %2651 = vmatprep.subr.mxu0 %v2246_v15 }
 0x8d1   : > { %2617 = vmatpush3.msra.mxu1 %v2198_v16  ;;  %2652 = vmatpush3.msra.mxu0 %v2230_v17 }
 0x8d2   : > { %2618 = vmatprep.subr.mxu1 %v2213_v19  ;;  %2653 = vmatprep.subr.mxu0 %v2245_v20 }
 0x8d3   : > { %2619 = vmatpush3.msra.mxu1 %v2197_v21  ;;  %2654 = vmatpush3.msra.mxu0 %v2229_v22 }
 0x8d4   : > { %2620 = vmatprep.subr.mxu1 %v2212_v23  ;;  %2655 = vmatprep.subr.mxu0 %v2244_v24 }
 0x8d5   : > { %2621 = vmatpush3.msra.mxu1 %v2196_v25  ;;  %2656 = vmatpush3.msra.mxu0 %v2228_v26  ;;  %v2535_v25 = vld [vmem:[%s3919_s6 + $0x3] ss:$0 sm:$0xff] }
 0x8d6   : > { %2622 = vmatprep.subr.mxu1 %v2211_v27  ;;  %2657 = vmatprep.subr.mxu0 %v2243_v28 }
 0x8d7   : > { %2623 = vmatpush3.msra.mxu1 %v2195_v29  ;;  %2658 = vmatpush3.msra.mxu0 %v2227_v30 }
 0x8d8   : > { %2624 = vmatprep.subr.mxu1 %v2210_v31  ;;  %2659 = vmatprep.subr.mxu0 %v2242_v62 }
 0x8d9   : > { %2625 = vmatpush3.msra.mxu1 %v2194_v32  ;;  %2660 = vmatpush3.msra.mxu0 %v2226_v1 }
 0x8da   : > { %2626 = vmatprep.subr.mxu1 %v2209_v33  ;;  %2661 = vmatprep.subr.mxu0 %v2241_v34 }
 0x8db   : > { %2627 = vmatpush3.msra.mxu1 %v2193_v35  ;;  %2662 = vmatpush3.msra.mxu0 %v2225_v4 }
 0x8dc   : > { %2628 = vmatprep.subr.mxu1 %v2208_v36  ;;  %2663 = vmatprep.subr.mxu0 %v2240_v37 }
 0x8dd   : > { %2629 = vmatpush3.msra.mxu1 %v2192_v38  ;;  %2664 = vmatpush3.msra.mxu0 %v2224_v18 }
 0x8de   : > { %2630 = vmatprep.subr.mxu1 %v2207_v39  ;;  %2665 = vmatprep.subr.mxu0 %v2239_v40 }
 0x8df   : > { %2631 = vmatpush3.msra.mxu1 %v2191_v41  ;;  %2666 = vmatpush3.msra.mxu0 %v2223_v42 }
 0x8e0   : > { %2632 = vmatprep.subr.mxu1 %v2206_v43  ;;  %2667 = vmatprep.subr.mxu0 %v2238_v45 }
 0x8e1   : > { %2633 = vmatpush3.msra.mxu1 %v2190_v46  ;;  %2668 = vmatpush3.msra.mxu0 %v2222_v47  ;;  %v2536_v47 = vld [vmem:[%s3919_s6 + $0x4] ss:$0 sm:$0xff] }
 0x8e2   : > { %2634 = vmatprep.subr.mxu1 %v2205_v48  ;;  %2669 = vmatprep.subr.mxu0 %v2237_v49  ;;  %v2537_v49 = vld [vmem:[%s3919_s6 + $0x5] ss:$0 sm:$0xff] }
 0x8e3   : > { %2635 = vmatpush3.msra.mxu1 %v2189_v50  ;;  %2670 = vmatpush3.msra.mxu0 %v2221_v51 }
 0x8e4   : > { %2636 = vmatprep.subr.mxu1 %v2204_v53  ;;  %2671 = vmatprep.subr.mxu0 %v2236_v54 }
 0x8e5   : > { %2637 = vmatpush3.msra.mxu1 %v2188_v55  ;;  %2672 = vmatpush3.msra.mxu0 %v2220_v56 }
 0x8e6   : > { %2638 = vmatprep.subr.mxu1 %v2203_v57  ;;  %2673 = vmatprep.subr.mxu0 %v2235_v44 }
 0x8e7   : > { %2639 = vmatpush3.msra.mxu1 %v2187_v58  ;;  %2674 = vmatpush3.msra.mxu0 %v2219_v59 }
 0x988   : > { %v2107_v10 = vpop.f32.mrf.mxu1  ;;  %v2178_v11 = vpop.f32.mrf.mxu0 }
 0x989   : > { %v2108_v12 = vadd.f32 %v2107_v10, %v2024_v7  ;;  %v2179_v13 = vadd.f32 %v2178_v11, %v2032_v8 }
 0x98a   : > { %v2109_v14 = vpop.f32.mrf.mxu1  ;;  %v2180_v15 = vpop.f32.mrf.mxu0 }
 0x98b   : > { %v2110_v16 = vadd.f32 %v2109_v14, %v2028_v9  ;;  %v2181_v17 = vadd.f32 %v2180_v15, %v2036_v52  ;;  %v2183_v21 = vmax.f32 %v2108_v12, 0.0  ;;  %v2185_v22 = vmax.f32 %v2179_v13, 0.0 }
 0x98d   : > { %v2184_v19 = vmax.f32 %v2110_v16, 0.0  ;;  %v2186_v20 = vmax.f32 %v2181_v17, 0.0 }
 0x98f   : > { %2320 = vmatprep.mubr.f32.mxu1 %v2184_v19  ;;  %2390 = vmatprep.mubr.f32.mxu0 %v2186_v20 }
 0x990   : > { %2321 = vmatmul.mubr.f32.vlgmr.msra.gmra.mxu1 %v2183_v21  ;;  %2391 = vmatmul.mubr.f32.vlgmr.msra.gmra.mxu0 %v2185_v22 }
 0xa50   : > { %v2640_v23 = vpop.f32.mrf.mxu1  ;;  %v2675_v24 = vpop.f32.mrf.mxu0 }
 0xa52   : > { %v2641_v26 = vpop.f32.mrf.mxu1  ;;  %v2676_v27 = vpop.f32.mrf.mxu0 }
 0xa53   : > { %v2642_v28 = vadd.f32 %v2641_v26, %v2640_v23  ;;  %v2677_v30 = vadd.f32 %v2676_v27, %v2675_v24 }
 0xa55   : > { %v2323_v29 = vadd.f32 %v2642_v28, %v2535_v25 }
 0xa57   : > { %v2393_v31 = vadd.f32 %v2677_v30, %v2323_v29 }
 0xa59   : > { %v2396_v62 = vadd.f32 %v2393_v31, %v3676_v61 }
 0xa5b   : > { %v2397_v32 = vrot.slane %v2396_v62, 4 }
 0xa5d   : > { %v2398_v1 = vadd.f32 %v2397_v32, %v2396_v62 }
 0xa5f   : > { %v2399_v33 = vrot.slane %v2398_v1, 2 }
 0xa61   : > { %v2400_v34 = vadd.f32 %v2399_v33, %v2398_v1 }
 0xa63   : > { %v2401_v35 = vrot.slane %v2400_v34, 1 }
 0xa65   : > { %v2402_v4 = vadd.f32 %v2401_v35, %v2400_v34 }
 0xa67   : > { %v2403_v36 = vmul.f32 0.125, %v2402_v4 }
 0xa69   : > { %v2404_v37 = vsub.f32 %v2396_v62, %v2403_v36 }
 0xa6b   : > { %v2405_v38 = vmul.f32 %v2404_v37, %v2404_v37 }
 0xa6d   : > { %v2406_v18 = vrot.slane %v2405_v38, 4 }
 0xa6f   : > { %v2407_v39 = vadd.f32 %v2406_v18, %v2405_v38 }
 0xa71   : > { %v2408_v40 = vrot.slane %v2407_v39, 2 }
 0xa73   : > { %v2409_v41 = vadd.f32 %v2408_v40, %v2407_v39 }
 0xa75   : > { %v2410_v42 = vrot.slane %v2409_v41, 1 }
 0xa77   : > { %v2411_v43 = vadd.f32 %v2410_v42, %v2409_v41 }
 0xa79   : > { %v2412_v45 = vmul.f32 0.125, %v2411_v43 }
 0xa7b   : > { %v2413_v46 = vadd.f32 1e-05, %v2412_v45 }
 0xa7d   : > { %2910 = vrsqrt.f32 %v2413_v46 }
 0xa8a   : > { %v2911_v61 = vpop.eup %2910 }
 0xa8b   : > { %v2415_v48 = vmul.f32 %v2911_v61, %v2404_v37 }
 0xa8d   : > { %v2421_v50 = vmul.f32 %v2536_v47, %v2415_v48 }
 0xa8f   : > { %v2427_v51 = vadd.f32 %v2537_v49, %v2421_v50 }
 0xa91   : > { %2428 = vst [vmem:[%s269_s15] sm:$0xff] %v2427_v51 }
 0xa92   : > { %2925 = shalt.err (!%p2922_p3)
}
 0xa93   : > { %s2926_s19 = scalar_lea.hbm %s2441_s8, 128  ;;  %s2930_s16 = scalar_lea.hbm %s3920_s7, 256 }
 0xa94   : > { %p2927_p4 = scmp.ne.s32.totalorder %s2441_s8, %s2926_s19  ;;  %p2931_p9 = scmp.lt.s32.totalorder %s2441_s8, %s3920_s7 }
 0xa95   : > { %p2932_p10 = scmp.lt.s32.totalorder %s2930_s16, %s2926_s19 }
 0xa96   : > { %p2928_p7 = pnand %p2927_p4, %p3062_p5 }
 0xa97   : > { %p2933_p11 = por %p2932_p10, %p2931_p9 }
 0xa98   : > { %p2929_p8 = pneg %p2928_p7 }
 0xa9a   : > { %p2934_p12 = pnand %p2933_p11, %p2929_p8 }
 0xa9c   : > { %2937 = shalt.err (!%p2934_p12)
}
 0xa9d   : > { %2828 = dma.vmem_to_hbm [thread:$0]  (%p3062_p5), %s2444_s22, 128, %s2441_s8, %s2430_s9  }
 0xa9e PF: > { %p2834_p13 = scmp.ge.s32.totalorder %s2972_s27, 2  ;;  %s2455_s23 = sand.u32 1, %s2960_s24  }
 0xa9f   : > { %s2456_s29 = scalar_lea.sflag [#allocation3], %s2455_s23 }
 0xaa0   : > { %p2831_p0 = pnand %p2834_p13, %p3066_p6 }
 0xaa2   : > { %p2832_p1 = pneg %p2831_p0 }
 0xaa4   : > { %2955 = dma.done.wait (%p2832_p1), %s2456_s29, 128  }
 0xaa5   : > { %2957 = vsyncadd (%p2832_p1), %s2456_s29, 4294967168  ;;  %p17_p2 = scmp.ge.s32.totalorder %s3049_s30, 4   ;;  %s3923_s24 = smov %s2964_s25 }
 0xaa6   : > { %s3924_s25 = smov %s2968_s26  ;;  %s3925_s26 = smov %s3060_s10 }
 0xaa7   : > { %s3926_s27 = smov %s3049_s30  ;;  %19 = sbr.rel (!%p17_p2) target bundleno = 3 (0x3), region = 83 }
 0xaac   :  { %2461 = vsyncpa [#allocation3], 1 }
 0xaad   :  { %2463 = vsyncpa [#allocation3 + $0x1], 1 }

</bundles_post_ra>
